<compile_context>
chip_gen: v7x
topology: tpu7x:2x2x1
jax: 0.10.0
libtpu: 0.0.40
codegen_flags: <defaults>
</compile_context>

<pallas_src>
import functools

import jax
import jax.numpy as jnp
import numpy as np
from jax.experimental import pallas as pl
from jax.experimental.pallas import tpu as pltpu


# ----------------------------------------------------------------------------
# Fused kernel: hoisted input projection + 2-layer LSTM recurrence +
# linear head + log_softmax. Single invocation; recurrence runs as an
# unrolled in-kernel fori_loop with all operands VMEM-resident.
# ----------------------------------------------------------------------------
def lstm2_fused_kernel(x_ref, h0_ref, c0_ref,
                       wx1_ref, wh1_ref, b1_ref,
                       wx2_ref, wh2_ref, b2_ref,
                       lw_ref, lb_ref,
                       out_ref, hN_ref, cN_ref,
                       gx_s, y_s, *, seq_len):
    TB = gx_s.shape[0]
    Bp = TB // seq_len                       # padded batch (multiple of 8)
    H = y_s.shape[-1]

    # ---- Hoisted layer-0 input projection: one (T*B, D) @ (D, 4H) matmul ----
    gx_s[...] = (jnp.dot(x_ref[...], wx1_ref[...],
                         preferred_element_type=jnp.float32)
                 + b1_ref[...])

    wh1 = wh1_ref[...]
    wx2 = wx2_ref[...]
    wh2 = wh2_ref[...]
    b2 = b2_ref[...]

    def split_gates(g):
        # PyTorch gate order: i, f, g, o
        i = jax.nn.sigmoid(g[:, 0 * H:1 * H])
        f = jax.nn.sigmoid(g[:, 1 * H:2 * H])
        c = jnp.tanh(g[:, 2 * H:3 * H])
        o = jax.nn.sigmoid(g[:, 3 * H:4 * H])
        return i, f, c, o

    def step(t, carry):
        h1, c1, h2, c2 = carry
        row = pl.multiple_of(t * Bp, 8)
        # layer 0: input-projection already precomputed, only h @ wh1 remains
        g1 = gx_s[pl.ds(row, Bp), :] + jnp.dot(
            h1, wh1, preferred_element_type=jnp.float32)
        i1, f1, gg1, o1 = split_gates(g1)
        c1n = f1 * c1 + i1 * gg1
        h1n = o1 * jnp.tanh(c1n)
        # inter-layer dropout (p=0.5) is identity in eval mode
        # layer 1
        g2 = (jnp.dot(h1n, wx2, preferred_element_type=jnp.float32)
              + jnp.dot(h2, wh2, preferred_element_type=jnp.float32)
              + b2)
        i2, f2, gg2, o2 = split_gates(g2)
        c2n = f2 * c2 + i2 * gg2
        h2n = o2 * jnp.tanh(c2n)
        y_s[pl.ds(row, Bp), :] = h2n
        return h1n, c1n, h2n, c2n

    h1, c1, h2, c2 = jax.lax.fori_loop(
        0, seq_len, step,
        (h0_ref[0], c0_ref[0], h0_ref[1], c0_ref[1]),
        unroll=True)

    # Final hidden/cell state written exactly once.
    hN_ref[0] = h1
    hN_ref[1] = h2
    cN_ref[0] = c1
    cN_ref[1] = c2

    # ---- Fused linear head + log_softmax on the whole (T*B, H) slab ----
    # (head dropout p=0.25 is identity in eval mode)
    logits = (jnp.dot(y_s[...], lw_ref[...],
                      preferred_element_type=jnp.float32)
              + lb_ref[...])
    m = jnp.max(logits, axis=-1, keepdims=True)
    z = logits - m
    lse = jnp.log(jnp.sum(jnp.exp(z), axis=-1, keepdims=True))
    out_ref[...] = z - lse


def run_lstm2_fused(x2d, h0, c0, wx1, wh1, b1, wx2, wh2, b2, lin_w, lin_b,
                    *, seq_len):
    """x2d: (T*Bp, D) time-major/flattened. Returns (log-probs (T*Bp, O),
    hN (2, Bp, H), cN (2, Bp, H))."""
    TB, D = x2d.shape
    Bp = TB // seq_len
    H = h0.shape[-1]
    O = lin_w.shape[-1]

    grid_spec = pltpu.PrefetchScalarGridSpec(
        num_scalar_prefetch=0,
        grid=(1,),
        in_specs=[
            pl.BlockSpec((TB, D), lambda i: (0, 0)),        # x (time-major, flat)
            pl.BlockSpec((2, Bp, H), lambda i: (0, 0, 0)),  # h0
            pl.BlockSpec((2, Bp, H), lambda i: (0, 0, 0)),  # c0
            pl.BlockSpec((D, 4 * H), lambda i: (0, 0)),     # wx1
            pl.BlockSpec((H, 4 * H), lambda i: (0, 0)),     # wh1
            pl.BlockSpec((1, 4 * H), lambda i: (0, 0)),     # b1
            pl.BlockSpec((H, 4 * H), lambda i: (0, 0)),     # wx2
            pl.BlockSpec((H, 4 * H), lambda i: (0, 0)),     # wh2
            pl.BlockSpec((1, 4 * H), lambda i: (0, 0)),     # b2
            pl.BlockSpec((H, O), lambda i: (0, 0)),         # lin_w
            pl.BlockSpec((1, O), lambda i: (0, 0)),         # lin_b
        ],
        out_specs=[
            pl.BlockSpec((TB, O), lambda i: (0, 0)),        # log-probs (time-major)
            pl.BlockSpec((2, Bp, H), lambda i: (0, 0, 0)),  # hN
            pl.BlockSpec((2, Bp, H), lambda i: (0, 0, 0)),  # cN
        ],
        scratch_shapes=[
            pltpu.VMEM((TB, 4 * H), jnp.float32),           # hoisted layer-0 gates
            pltpu.VMEM((TB, H), jnp.float32),               # per-step layer-1 outputs
        ],
    )

    kernel = functools.partial(lstm2_fused_kernel, seq_len=seq_len)
    return pl.pallas_call(
        kernel,
        out_shape=(
            jax.ShapeDtypeStruct((TB, O), jnp.float32),
            jax.ShapeDtypeStruct((2, Bp, H), jnp.float32),
            jax.ShapeDtypeStruct((2, Bp, H), jnp.float32),
        ),
        grid_spec=grid_spec,
        compiler_params=pltpu.CompilerParams(
            dimension_semantics=("arbitrary",)),  # single sequential step
    )(x2d, h0, c0, wx1, wh1, b1, wx2, wh2, b2, lin_w, lin_b)


# ----------------------------------------------------------------------------
# Full module forward (glue in plain JAX: embedding gathers, batch padding).
# ----------------------------------------------------------------------------
@jax.jit
def lstm_module_forward(params, input_ids, category_ids, hidden):
    h0, c0 = hidden                                    # each (2, B, H)
    B, T = input_ids.shape
    H = h0.shape[-1]

    # Build the time-major input directly from the gather (no activation transpose).
    name_emb = params["name_embed"][input_ids.T]       # (T, B, name_dim)
    cat_vec = params["cat_embed"][category_ids[:, 0]]  # (B, cat_dim)
    cat_emb = jnp.broadcast_to(cat_vec[None, :, :],
                               (T, B, cat_vec.shape[-1]))   # .repeat(1, T, 1)
    x_tm = jnp.concatenate([name_emb, cat_emb], axis=-1)    # (T, B, D)
    D = x_tm.shape[-1]

    # Pad batch up to sublane width (8) so vregs are not mostly masked padding.
    Bp = ((B + 7) // 8) * 8
    if Bp != B:
        x_tm = jnp.pad(x_tm, ((0, 0), (0, Bp - B), (0, 0)))
        h0p = jnp.pad(h0, ((0, 0), (0, Bp - B), (0, 0)))
        c0p = jnp.pad(c0, ((0, 0), (0, Bp - B), (0, 0)))
    else:
        h0p, c0p = h0, c0

    x2d = x_tm.reshape(T * Bp, D)

    out_flat, hNp, cNp = run_lstm2_fused(
        x2d, h0p, c0p,
        params["wx1"], params["wh1"], params["b1"],
        params["wx2"], params["wh2"], params["b2"],
        params["lin_w"], params["lin_b"],
        seq_len=T)

    out = out_flat.reshape(T, Bp, -1)[:, :B, :]        # (T, B, O)
    out = jnp.transpose(out, (1, 0, 2))                # (B, T, O) batch_first
    hN = hNp[:, :B, :]
    cN = cNp[:, :B, :]
    return out, (hN, cN)


# ----------------------------------------------------------------------------
# Pure-JAX reference (mirrors torch semantics) for validation.
# ----------------------------------------------------------------------------
def reference_forward(params, input_ids, category_ids, hidden):
    h0, c0 = hidden
    name_emb = params["name_embed"][input_ids]
    cat_emb = params["cat_embed"][category_ids]
    B, T, _ = name_emb.shape
    cat_emb = jnp.broadcast_to(cat_emb, (B, T, cat_emb.shape[-1]))
    x = jnp.concatenate([name_emb, cat_emb], axis=-1)

    def cell(xt, h, c, wx, wh, b):
        gates = xt @ wx + h @ wh + b
        H = h.shape[-1]
        i = jax.nn.sigmoid(gates[:, :H])
        f = jax.nn.sigmoid(gates[:, H:2 * H])
        g = jnp.tanh(gates[:, 2 * H:3 * H])
        o = jax.nn.sigmoid(gates[:, 3 * H:])
        c = f * c + i * g
        h = o * jnp.tanh(c)
        return h, c

    h1, c1 = h0[0], c0[0]
    h2, c2 = h0[1], c0[1]
    ys = []
    for t in range(T):
        h1, c1 = cell(x[:, t], h1, c1, params["wx1"], params["wh1"], params["b1"])
        h2, c2 = cell(h1, h2, c2, params["wx2"], params["wh2"], params["b2"])
        ys.append(h2)
    y = jnp.stack(ys, axis=1)                          # (B, T, H)
    logits = y @ params["lin_w"] + params["lin_b"]
    out = jax.nn.log_softmax(logits, axis=2)
    hN = jnp.stack([h1, h2], axis=0)
    cN = jnp.stack([c1, c2], axis=0)
    return out, (hN, cN)


if __name__ == "__main__":
    # Module hyper-parameters (small, consistent with the forward pass)
    input_size = 32        # name vocab
    hidden_size = 32
    output_size = 32
    name_embed_dim = 16
    cat_embed_dim = 8
    n_categories = 4
    batch = 2
    seq = 8
    D = name_embed_dim + cat_embed_dim

    key = jax.random.PRNGKey(0)
    keys = jax.random.split(key, 12)

    def init(k, shape, scale=0.1):
        return (scale * jax.random.normal(k, shape)).astype(jnp.float32)

    params = {
        "name_embed": init(keys[0], (input_size, name_embed_dim)),
        "cat_embed": init(keys[1], (n_categories, cat_embed_dim)),
        # layer 0: torch W_ih (4H, D), W_hh (4H, H) stored transposed; bias = b_ih + b_hh
        "wx1": init(keys[2], (D, 4 * hidden_size)),
        "wh1": init(keys[3], (hidden_size, 4 * hidden_size)),
        "b1": init(keys[4], (1, 4 * hidden_size)),
        # layer 1
        "wx2": init(keys[5], (hidden_size, 4 * hidden_size)),
        "wh2": init(keys[6], (hidden_size, 4 * hidden_size)),
        "b2": init(keys[7], (1, 4 * hidden_size)),
        # linear head: torch weight (O, H) stored transposed as (H, O)
        "lin_w": init(keys[8], (hidden_size, output_size)),
        "lin_b": init(keys[9], (1, output_size)),
    }

    input_ids = jax.random.randint(keys[10], (batch, seq), 0, input_size)
    category_ids = jax.random.randint(keys[11], (batch, 1), 0, n_categories)
    h0 = jnp.zeros((2, batch, hidden_size), jnp.float32)   # num_layers=2
    c0 = jnp.zeros((2, batch, hidden_size), jnp.float32)

    out, (hN, cN) = jax.block_until_ready(
        lstm_module_forward(params, input_ids, category_ids, (h0, c0)))

    ref_out, (ref_hN, ref_cN) = reference_forward(
        params, input_ids, category_ids, (h0, c0))

    assert out.shape == (batch, seq, output_size)
    assert hN.shape == (2, batch, hidden_size) and cN.shape == (2, batch, hidden_size)
    np.testing.assert_allclose(np.asarray(out), np.asarray(ref_out), atol=1e-4, rtol=1e-4)
    np.testing.assert_allclose(np.asarray(hN), np.asarray(ref_hN), atol=1e-4, rtol=1e-4)
    np.testing.assert_allclose(np.asarray(cN), np.asarray(ref_cN), atol=1e-4, rtol=1e-4)

    print("KERNEL_OK")
</pallas_src>

<mosaic_0001>
module attributes {stable_mosaic.version = 11 : i64} {
  func.func @lstm2_fused_kernel(%arg0: i32, %arg1: memref<64x24xf32, #tpu.memory_space<vmem>>, %arg2: memref<2x8x32xf32, #tpu.memory_space<vmem>>, %arg3: memref<2x8x32xf32, #tpu.memory_space<vmem>>, %arg4: memref<24x128xf32, #tpu.memory_space<vmem>>, %arg5: memref<32x128xf32, #tpu.memory_space<vmem>>, %arg6: memref<1x128xf32, #tpu.memory_space<vmem>>, %arg7: memref<32x128xf32, #tpu.memory_space<vmem>>, %arg8: memref<32x128xf32, #tpu.memory_space<vmem>>, %arg9: memref<1x128xf32, #tpu.memory_space<vmem>>, %arg10: memref<32x32xf32, #tpu.memory_space<vmem>>, %arg11: memref<1x32xf32, #tpu.memory_space<vmem>>, %arg12: memref<64x32xf32, #tpu.memory_space<vmem>>, %arg13: memref<2x8x32xf32, #tpu.memory_space<vmem>>, %arg14: memref<2x8x32xf32, #tpu.memory_space<vmem>>, %arg15: memref<64x128xf32, #tpu.memory_space<vmem>>, %arg16: memref<64x32xf32, #tpu.memory_space<vmem>>) attributes {dimension_semantics = [#tpu.dimension_semantics<arbitrary>], iteration_bounds = array<i64: 1>, scalar_prefetch = 0 : i64, scratch_operands = 2 : i64, tpu.core_type = #tpu.core_type<tc>, window_params = [{pipeline_mode = #tpu.pipeline_mode<synchronous>, transform_indices = @transform_0, window_bounds = array<i64: 64, 24>}, {pipeline_mode = #tpu.pipeline_mode<synchronous>, transform_indices = @transform_1, window_bounds = array<i64: 2, 8, 32>}, {pipeline_mode = #tpu.pipeline_mode<synchronous>, transform_indices = @transform_2, window_bounds = array<i64: 2, 8, 32>}, {pipeline_mode = #tpu.pipeline_mode<synchronous>, transform_indices = @transform_3, window_bounds = array<i64: 24, 128>}, {pipeline_mode = #tpu.pipeline_mode<synchronous>, transform_indices = @transform_4, window_bounds = array<i64: 32, 128>}, {pipeline_mode = #tpu.pipeline_mode<synchronous>, transform_indices = @transform_5, window_bounds = array<i64: 1, 128>}, {pipeline_mode = #tpu.pipeline_mode<synchronous>, transform_indices = @transform_6, window_bounds = array<i64: 32, 128>}, {pipeline_mode = #tpu.pipeline_mode<synchronous>, transform_indices = @transform_7, window_bounds = array<i64: 32, 128>}, {pipeline_mode = #tpu.pipeline_mode<synchronous>, transform_indices = @transform_8, window_bounds = array<i64: 1, 128>}, {pipeline_mode = #tpu.pipeline_mode<synchronous>, transform_indices = @transform_9, window_bounds = array<i64: 32, 32>}, {pipeline_mode = #tpu.pipeline_mode<synchronous>, transform_indices = @transform_10, window_bounds = array<i64: 1, 32>}, {pipeline_mode = #tpu.pipeline_mode<synchronous>, transform_indices = @transform_11, window_bounds = array<i64: 64, 32>}, {pipeline_mode = #tpu.pipeline_mode<synchronous>, transform_indices = @transform_12, window_bounds = array<i64: 2, 8, 32>}, {pipeline_mode = #tpu.pipeline_mode<synchronous>, transform_indices = @transform_13, window_bounds = array<i64: 2, 8, 32>}]} {
    %c0 = arith.constant 0 : index
    %c0_0 = arith.constant 0 : index
    %0 = vector.load %arg1[%c0, %c0_0] : memref<64x24xf32, #tpu.memory_space<vmem>>, vector<64x24xf32>
    %c0_1 = arith.constant 0 : index
    %c0_2 = arith.constant 0 : index
    %1 = vector.load %arg4[%c0_1, %c0_2] : memref<24x128xf32, #tpu.memory_space<vmem>>, vector<24x128xf32>
    %cst = arith.constant dense<0.000000e+00> : vector<64x128xf32>
    %2 = tpu.matmul %0, %1, %cst {dimension_numbers = #tpu.dot_dimension_numbers<[1], [0], [0], [1], [0, 0, 1, 1], [], []>} : vector<64x24xf32>, vector<24x128xf32>, vector<64x128xf32> -> vector<64x128xf32>
    %c0_3 = arith.constant 0 : index
    %c0_4 = arith.constant 0 : index
    %3 = vector.load %arg6[%c0_3, %c0_4] : memref<1x128xf32, #tpu.memory_space<vmem>>, vector<1x128xf32>
    %4 = vector.broadcast %3 : vector<1x128xf32> to vector<64x128xf32>
    %5 = arith.addf %2, %4 : vector<64x128xf32>
    %c0_5 = arith.constant 0 : index
    %c0_6 = arith.constant 0 : index
    %6 = vector.load %arg15[%c0_5, %c0_6] : memref<64x128xf32, #tpu.memory_space<vmem>>, vector<64x128xf32>
    tpu.vector_store %arg15[%c0_5, %c0_6], %5 {strides = array<i32>} : memref<64x128xf32, #tpu.memory_space<vmem>>, vector<64x128xf32>,
    %c0_7 = arith.constant 0 : index
    %c0_8 = arith.constant 0 : index
    %7 = vector.load %arg5[%c0_7, %c0_8] : memref<32x128xf32, #tpu.memory_space<vmem>>, vector<32x128xf32>
    %c0_9 = arith.constant 0 : index
    %c0_10 = arith.constant 0 : index
    %8 = vector.load %arg7[%c0_9, %c0_10] : memref<32x128xf32, #tpu.memory_space<vmem>>, vector<32x128xf32>
    %c0_11 = arith.constant 0 : index
    %c0_12 = arith.constant 0 : index
    %9 = vector.load %arg8[%c0_11, %c0_12] : memref<32x128xf32, #tpu.memory_space<vmem>>, vector<32x128xf32>
    %c0_13 = arith.constant 0 : index
    %c0_14 = arith.constant 0 : index
    %10 = vector.load %arg9[%c0_13, %c0_14] : memref<1x128xf32, #tpu.memory_space<vmem>>, vector<1x128xf32>
    %c0_15 = arith.constant 0 : index
    %c0_16 = arith.constant 0 : index
    %c0_17 = arith.constant 0 : index
    %11 = vector.load %arg2[%c0_15, %c0_16, %c0_17] : memref<2x8x32xf32, #tpu.memory_space<vmem>>, vector<1x8x32xf32>
    %12 = vector.shape_cast %11 : vector<1x8x32xf32> to vector<8x32xf32>
    %c0_18 = arith.constant 0 : index
    %c0_19 = arith.constant 0 : index
    %c0_20 = arith.constant 0 : index
    %13 = vector.load %arg3[%c0_18, %c0_19, %c0_20] : memref<2x8x32xf32, #tpu.memory_space<vmem>>, vector<1x8x32xf32>
    %14 = vector.shape_cast %13 : vector<1x8x32xf32> to vector<8x32xf32>
    %c1 = arith.constant 1 : index
    %c0_21 = arith.constant 0 : index
    %c0_22 = arith.constant 0 : index
    %15 = vector.load %arg2[%c1, %c0_21, %c0_22] : memref<2x8x32xf32, #tpu.memory_space<vmem>>, vector<1x8x32xf32>
    %16 = vector.shape_cast %15 : vector<1x8x32xf32> to vector<8x32xf32>
    %c1_23 = arith.constant 1 : index
    %c0_24 = arith.constant 0 : index
    %c0_25 = arith.constant 0 : index
    %17 = vector.load %arg3[%c1_23, %c0_24, %c0_25] : memref<2x8x32xf32, #tpu.memory_space<vmem>>, vector<1x8x32xf32>
    %18 = vector.shape_cast %17 : vector<1x8x32xf32> to vector<8x32xf32>
    %c0_i32 = arith.constant 0 : i32
    %c8_i32 = arith.constant 8 : i32
    %19 = arith.muli %c0_i32, %c8_i32 : i32
    %20 = tpu.assume_multiple %19, 8 : i32
    %21 = arith.index_cast %20 : i32 to index
    %c0_26 = arith.constant 0 : index
    %22 = vector.load %arg15[%21, %c0_26] : memref<64x128xf32, #tpu.memory_space<vmem>>, vector<8x128xf32>
    %cst_27 = arith.constant dense<0.000000e+00> : vector<8x128xf32>
    %23 = tpu.matmul %12, %7, %cst_27 {dimension_numbers = #tpu.dot_dimension_numbers<[1], [0], [0], [1], [0, 0, 1, 1], [], []>} : vector<8x32xf32>, vector<32x128xf32>, vector<8x128xf32> -> vector<8x128xf32>
    %24 = arith.addf %22, %23 : vector<8x128xf32>
    %25 = vector.extract_strided_slice %24 {offsets = [0, 0], sizes = [8, 32], strides = [1, 1]} : vector<8x128xf32> to vector<8x32xf32>
    %26 = arith.negf %25 : vector<8x32xf32>
    %27 = math.exp %26 : vector<8x32xf32>
    %cst_28 = arith.constant 1.000000e+00 : f32
    %28 = vector.broadcast %cst_28 : f32 to vector<8x32xf32>
    %29 = arith.addf %28, %27 : vector<8x32xf32>
    %30 = arith.divf %28, %29 : vector<8x32xf32>
    %31 = vector.extract_strided_slice %24 {offsets = [0, 32], sizes = [8, 32], strides = [1, 1]} : vector<8x128xf32> to vector<8x32xf32>
    %32 = arith.negf %31 : vector<8x32xf32>
    %33 = math.exp %32 : vector<8x32xf32>
    %cst_29 = arith.constant 1.000000e+00 : f32
    %34 = vector.broadcast %cst_29 : f32 to vector<8x32xf32>
    %35 = arith.addf %34, %33 : vector<8x32xf32>
    %36 = arith.divf %34, %35 : vector<8x32xf32>
    %37 = vector.extract_strided_slice %24 {offsets = [0, 64], sizes = [8, 32], strides = [1, 1]} : vector<8x128xf32> to vector<8x32xf32>
    %38 = math.tanh %37 : vector<8x32xf32>
    %39 = vector.extract_strided_slice %24 {offsets = [0, 96], sizes = [8, 32], strides = [1, 1]} : vector<8x128xf32> to vector<8x32xf32>
    %40 = arith.negf %39 : vector<8x32xf32>
    %41 = math.exp %40 : vector<8x32xf32>
    %cst_30 = arith.constant 1.000000e+00 : f32
    %42 = vector.broadcast %cst_30 : f32 to vector<8x32xf32>
    %43 = arith.addf %42, %41 : vector<8x32xf32>
    %44 = arith.divf %42, %43 : vector<8x32xf32>
    %45 = arith.mulf %36, %14 : vector<8x32xf32>
    %46 = arith.mulf %30, %38 : vector<8x32xf32>
    %47 = arith.addf %45, %46 : vector<8x32xf32>
    %48 = math.tanh %47 : vector<8x32xf32>
    %49 = arith.mulf %44, %48 : vector<8x32xf32>
    %cst_31 = arith.constant dense<0.000000e+00> : vector<8x128xf32>
    %50 = tpu.matmul %49, %8, %cst_31 {dimension_numbers = #tpu.dot_dimension_numbers<[1], [0], [0], [1], [0, 0, 1, 1], [], []>} : vector<8x32xf32>, vector<32x128xf32>, vector<8x128xf32> -> vector<8x128xf32>
    %cst_32 = arith.constant dense<0.000000e+00> : vector<8x128xf32>
    %51 = tpu.matmul %16, %9, %cst_32 {dimension_numbers = #tpu.dot_dimension_numbers<[1], [0], [0], [1], [0, 0, 1, 1], [], []>} : vector<8x32xf32>, vector<32x128xf32>, vector<8x128xf32> -> vector<8x128xf32>
    %52 = arith.addf %50, %51 : vector<8x128xf32>
    %53 = vector.broadcast %10 : vector<1x128xf32> to vector<8x128xf32>
    %54 = arith.addf %52, %53 : vector<8x128xf32>
    %55 = vector.extract_strided_slice %54 {offsets = [0, 0], sizes = [8, 32], strides = [1, 1]} : vector<8x128xf32> to vector<8x32xf32>
    %56 = arith.negf %55 : vector<8x32xf32>
    %57 = math.exp %56 : vector<8x32xf32>
    %cst_33 = arith.constant 1.000000e+00 : f32
    %58 = vector.broadcast %cst_33 : f32 to vector<8x32xf32>
    %59 = arith.addf %58, %57 : vector<8x32xf32>
    %60 = arith.divf %58, %59 : vector<8x32xf32>
    %61 = vector.extract_strided_slice %54 {offsets = [0, 32], sizes = [8, 32], strides = [1, 1]} : vector<8x128xf32> to vector<8x32xf32>
    %62 = arith.negf %61 : vector<8x32xf32>
    %63 = math.exp %62 : vector<8x32xf32>
    %cst_34 = arith.constant 1.000000e+00 : f32
    %64 = vector.broadcast %cst_34 : f32 to vector<8x32xf32>
    %65 = arith.addf %64, %63 : vector<8x32xf32>
    %66 = arith.divf %64, %65 : vector<8x32xf32>
    %67 = vector.extract_strided_slice %54 {offsets = [0, 64], sizes = [8, 32], strides = [1, 1]} : vector<8x128xf32> to vector<8x32xf32>
    %68 = math.tanh %67 : vector<8x32xf32>
    %69 = vector.extract_strided_slice %54 {offsets = [0, 96], sizes = [8, 32], strides = [1, 1]} : vector<8x128xf32> to vector<8x32xf32>
    %70 = arith.negf %69 : vector<8x32xf32>
    %71 = math.exp %70 : vector<8x32xf32>
    %cst_35 = arith.constant 1.000000e+00 : f32
    %72 = vector.broadcast %cst_35 : f32 to vector<8x32xf32>
    %73 = arith.addf %72, %71 : vector<8x32xf32>
    %74 = arith.divf %72, %73 : vector<8x32xf32>
    %75 = arith.mulf %66, %18 : vector<8x32xf32>
    %76 = arith.mulf %60, %68 : vector<8x32xf32>
    %77 = arith.addf %75, %76 : vector<8x32xf32>
    %78 = math.tanh %77 : vector<8x32xf32>
    %79 = arith.mulf %74, %78 : vector<8x32xf32>
    %80 = arith.index_cast %20 : i32 to index
    %c0_36 = arith.constant 0 : index
    %81 = vector.load %arg16[%80, %c0_36] : memref<64x32xf32, #tpu.memory_space<vmem>>, vector<8x32xf32>
    tpu.vector_store %arg16[%80, %c0_36], %79 {strides = array<i32>} : memref<64x32xf32, #tpu.memory_space<vmem>>, vector<8x32xf32>,
    %c1_i32 = arith.constant 1 : i32
    %c8_i32_37 = arith.constant 8 : i32
    %82 = arith.muli %c1_i32, %c8_i32_37 : i32
    %83 = tpu.assume_multiple %82, 8 : i32
    %84 = arith.index_cast %83 : i32 to index
    %c0_38 = arith.constant 0 : index
    %85 = vector.load %arg15[%84, %c0_38] : memref<64x128xf32, #tpu.memory_space<vmem>>, vector<8x128xf32>
    %cst_39 = arith.constant dense<0.000000e+00> : vector<8x128xf32>
    %86 = tpu.matmul %49, %7, %cst_39 {dimension_numbers = #tpu.dot_dimension_numbers<[1], [0], [0], [1], [0, 0, 1, 1], [], []>} : vector<8x32xf32>, vector<32x128xf32>, vector<8x128xf32> -> vector<8x128xf32>
    %87 = arith.addf %85, %86 : vector<8x128xf32>
    %88 = vector.extract_strided_slice %87 {offsets = [0, 0], sizes = [8, 32], strides = [1, 1]} : vector<8x128xf32> to vector<8x32xf32>
    %89 = arith.negf %88 : vector<8x32xf32>
    %90 = math.exp %89 : vector<8x32xf32>
    %cst_40 = arith.constant 1.000000e+00 : f32
    %91 = vector.broadcast %cst_40 : f32 to vector<8x32xf32>
    %92 = arith.addf %91, %90 : vector<8x32xf32>
    %93 = arith.divf %91, %92 : vector<8x32xf32>
    %94 = vector.extract_strided_slice %87 {offsets = [0, 32], sizes = [8, 32], strides = [1, 1]} : vector<8x128xf32> to vector<8x32xf32>
    %95 = arith.negf %94 : vector<8x32xf32>
    %96 = math.exp %95 : vector<8x32xf32>
    %cst_41 = arith.constant 1.000000e+00 : f32
    %97 = vector.broadcast %cst_41 : f32 to vector<8x32xf32>
    %98 = arith.addf %97, %96 : vector<8x32xf32>
    %99 = arith.divf %97, %98 : vector<8x32xf32>
    %100 = vector.extract_strided_slice %87 {offsets = [0, 64], sizes = [8, 32], strides = [1, 1]} : vector<8x128xf32> to vector<8x32xf32>
    %101 = math.tanh %100 : vector<8x32xf32>
    %102 = vector.extract_strided_slice %87 {offsets = [0, 96], sizes = [8, 32], strides = [1, 1]} : vector<8x128xf32> to vector<8x32xf32>
    %103 = arith.negf %102 : vector<8x32xf32>
    %104 = math.exp %103 : vector<8x32xf32>
    %cst_42 = arith.constant 1.000000e+00 : f32
    %105 = vector.broadcast %cst_42 : f32 to vector<8x32xf32>
    %106 = arith.addf %105, %104 : vector<8x32xf32>
    %107 = arith.divf %105, %106 : vector<8x32xf32>
    %108 = arith.mulf %99, %47 : vector<8x32xf32>
    %109 = arith.mulf %93, %101 : vector<8x32xf32>
    %110 = arith.addf %108, %109 : vector<8x32xf32>
    %111 = math.tanh %110 : vector<8x32xf32>
    %112 = arith.mulf %107, %111 : vector<8x32xf32>
    %cst_43 = arith.constant dense<0.000000e+00> : vector<8x128xf32>
    %113 = tpu.matmul %112, %8, %cst_43 {dimension_numbers = #tpu.dot_dimension_numbers<[1], [0], [0], [1], [0, 0, 1, 1], [], []>} : vector<8x32xf32>, vector<32x128xf32>, vector<8x128xf32> -> vector<8x128xf32>
    %cst_44 = arith.constant dense<0.000000e+00> : vector<8x128xf32>
    %114 = tpu.matmul %79, %9, %cst_44 {dimension_numbers = #tpu.dot_dimension_numbers<[1], [0], [0], [1], [0, 0, 1, 1], [], []>} : vector<8x32xf32>, vector<32x128xf32>, vector<8x128xf32> -> vector<8x128xf32>
    %115 = arith.addf %113, %114 : vector<8x128xf32>
    %116 = vector.broadcast %10 : vector<1x128xf32> to vector<8x128xf32>
    %117 = arith.addf %115, %116 : vector<8x128xf32>
    %118 = vector.extract_strided_slice %117 {offsets = [0, 0], sizes = [8, 32], strides = [1, 1]} : vector<8x128xf32> to vector<8x32xf32>
    %119 = arith.negf %118 : vector<8x32xf32>
    %120 = math.exp %119 : vector<8x32xf32>
    %cst_45 = arith.constant 1.000000e+00 : f32
    %121 = vector.broadcast %cst_45 : f32 to vector<8x32xf32>
    %122 = arith.addf %121, %120 : vector<8x32xf32>
    %123 = arith.divf %121, %122 : vector<8x32xf32>
    %124 = vector.extract_strided_slice %117 {offsets = [0, 32], sizes = [8, 32], strides = [1, 1]} : vector<8x128xf32> to vector<8x32xf32>
    %125 = arith.negf %124 : vector<8x32xf32>
    %126 = math.exp %125 : vector<8x32xf32>
    %cst_46 = arith.constant 1.000000e+00 : f32
    %127 = vector.broadcast %cst_46 : f32 to vector<8x32xf32>
    %128 = arith.addf %127, %126 : vector<8x32xf32>
    %129 = arith.divf %127, %128 : vector<8x32xf32>
    %130 = vector.extract_strided_slice %117 {offsets = [0, 64], sizes = [8, 32], strides = [1, 1]} : vector<8x128xf32> to vector<8x32xf32>
    %131 = math.tanh %130 : vector<8x32xf32>
    %132 = vector.extract_strided_slice %117 {offsets = [0, 96], sizes = [8, 32], strides = [1, 1]} : vector<8x128xf32> to vector<8x32xf32>
    %133 = arith.negf %132 : vector<8x32xf32>
    %134 = math.exp %133 : vector<8x32xf32>
    %cst_47 = arith.constant 1.000000e+00 : f32
    %135 = vector.broadcast %cst_47 : f32 to vector<8x32xf32>
    %136 = arith.addf %135, %134 : vector<8x32xf32>
    %137 = arith.divf %135, %136 : vector<8x32xf32>
    %138 = arith.mulf %129, %77 : vector<8x32xf32>
    %139 = arith.mulf %123, %131 : vector<8x32xf32>
    %140 = arith.addf %138, %139 : vector<8x32xf32>
    %141 = math.tanh %140 : vector<8x32xf32>
    %142 = arith.mulf %137, %141 : vector<8x32xf32>
    %143 = arith.index_cast %83 : i32 to index
    %c0_48 = arith.constant 0 : index
    %144 = vector.load %arg16[%143, %c0_48] : memref<64x32xf32, #tpu.memory_space<vmem>>, vector<8x32xf32>
    tpu.vector_store %arg16[%143, %c0_48], %142 {strides = array<i32>} : memref<64x32xf32, #tpu.memory_space<vmem>>, vector<8x32xf32>,
    %c2_i32 = arith.constant 2 : i32
    %c8_i32_49 = arith.constant 8 : i32
    %145 = arith.muli %c2_i32, %c8_i32_49 : i32
    %146 = tpu.assume_multiple %145, 8 : i32
    %147 = arith.index_cast %146 : i32 to index
    %c0_50 = arith.constant 0 : index
    %148 = vector.load %arg15[%147, %c0_50] : memref<64x128xf32, #tpu.memory_space<vmem>>, vector<8x128xf32>
    %cst_51 = arith.constant dense<0.000000e+00> : vector<8x128xf32>
    %149 = tpu.matmul %112, %7, %cst_51 {dimension_numbers = #tpu.dot_dimension_numbers<[1], [0], [0], [1], [0, 0, 1, 1], [], []>} : vector<8x32xf32>, vector<32x128xf32>, vector<8x128xf32> -> vector<8x128xf32>
    %150 = arith.addf %148, %149 : vector<8x128xf32>
    %151 = vector.extract_strided_slice %150 {offsets = [0, 0], sizes = [8, 32], strides = [1, 1]} : vector<8x128xf32> to vector<8x32xf32>
    %152 = arith.negf %151 : vector<8x32xf32>
    %153 = math.exp %152 : vector<8x32xf32>
    %cst_52 = arith.constant 1.000000e+00 : f32
    %154 = vector.broadcast %cst_52 : f32 to vector<8x32xf32>
    %155 = arith.addf %154, %153 : vector<8x32xf32>
    %156 = arith.divf %154, %155 : vector<8x32xf32>
    %157 = vector.extract_strided_slice %150 {offsets = [0, 32], sizes = [8, 32], strides = [1, 1]} : vector<8x128xf32> to vector<8x32xf32>
    %158 = arith.negf %157 : vector<8x32xf32>
    %159 = math.exp %158 : vector<8x32xf32>
    %cst_53 = arith.constant 1.000000e+00 : f32
    %160 = vector.broadcast %cst_53 : f32 to vector<8x32xf32>
    %161 = arith.addf %160, %159 : vector<8x32xf32>
    %162 = arith.divf %160, %161 : vector<8x32xf32>
    %163 = vector.extract_strided_slice %150 {offsets = [0, 64], sizes = [8, 32], strides = [1, 1]} : vector<8x128xf32> to vector<8x32xf32>
    %164 = math.tanh %163 : vector<8x32xf32>
    %165 = vector.extract_strided_slice %150 {offsets = [0, 96], sizes = [8, 32], strides = [1, 1]} : vector<8x128xf32> to vector<8x32xf32>
    %166 = arith.negf %165 : vector<8x32xf32>
    %167 = math.exp %166 : vector<8x32xf32>
    %cst_54 = arith.constant 1.000000e+00 : f32
    %168 = vector.broadcast %cst_54 : f32 to vector<8x32xf32>
    %169 = arith.addf %168, %167 : vector<8x32xf32>
    %170 = arith.divf %168, %169 : vector<8x32xf32>
    %171 = arith.mulf %162, %110 : vector<8x32xf32>
    %172 = arith.mulf %156, %164 : vector<8x32xf32>
    %173 = arith.addf %171, %172 : vector<8x32xf32>
    %174 = math.tanh %173 : vector<8x32xf32>
    %175 = arith.mulf %170, %174 : vector<8x32xf32>
    %cst_55 = arith.constant dense<0.000000e+00> : vector<8x128xf32>
    %176 = tpu.matmul %175, %8, %cst_55 {dimension_numbers = #tpu.dot_dimension_numbers<[1], [0], [0], [1], [0, 0, 1, 1], [], []>} : vector<8x32xf32>, vector<32x128xf32>, vector<8x128xf32> -> vector<8x128xf32>
    %cst_56 = arith.constant dense<0.000000e+00> : vector<8x128xf32>
    %177 = tpu.matmul %142, %9, %cst_56 {dimension_numbers = #tpu.dot_dimension_numbers<[1], [0], [0], [1], [0, 0, 1, 1], [], []>} : vector<8x32xf32>, vector<32x128xf32>, vector<8x128xf32> -> vector<8x128xf32>
    %178 = arith.addf %176, %177 : vector<8x128xf32>
    %179 = vector.broadcast %10 : vector<1x128xf32> to vector<8x128xf32>
    %180 = arith.addf %178, %179 : vector<8x128xf32>
    %181 = vector.extract_strided_slice %180 {offsets = [0, 0], sizes = [8, 32], strides = [1, 1]} : vector<8x128xf32> to vector<8x32xf32>
    %182 = arith.negf %181 : vector<8x32xf32>
    %183 = math.exp %182 : vector<8x32xf32>
    %cst_57 = arith.constant 1.000000e+00 : f32
    %184 = vector.broadcast %cst_57 : f32 to vector<8x32xf32>
    %185 = arith.addf %184, %183 : vector<8x32xf32>
    %186 = arith.divf %184, %185 : vector<8x32xf32>
    %187 = vector.extract_strided_slice %180 {offsets = [0, 32], sizes = [8, 32], strides = [1, 1]} : vector<8x128xf32> to vector<8x32xf32>
    %188 = arith.negf %187 : vector<8x32xf32>
    %189 = math.exp %188 : vector<8x32xf32>
    %cst_58 = arith.constant 1.000000e+00 : f32
    %190 = vector.broadcast %cst_58 : f32 to vector<8x32xf32>
    %191 = arith.addf %190, %189 : vector<8x32xf32>
    %192 = arith.divf %190, %191 : vector<8x32xf32>
    %193 = vector.extract_strided_slice %180 {offsets = [0, 64], sizes = [8, 32], strides = [1, 1]} : vector<8x128xf32> to vector<8x32xf32>
    %194 = math.tanh %193 : vector<8x32xf32>
    %195 = vector.extract_strided_slice %180 {offsets = [0, 96], sizes = [8, 32], strides = [1, 1]} : vector<8x128xf32> to vector<8x32xf32>
    %196 = arith.negf %195 : vector<8x32xf32>
    %197 = math.exp %196 : vector<8x32xf32>
    %cst_59 = arith.constant 1.000000e+00 : f32
    %198 = vector.broadcast %cst_59 : f32 to vector<8x32xf32>
    %199 = arith.addf %198, %197 : vector<8x32xf32>
    %200 = arith.divf %198, %199 : vector<8x32xf32>
    %201 = arith.mulf %192, %140 : vector<8x32xf32>
    %202 = arith.mulf %186, %194 : vector<8x32xf32>
    %203 = arith.addf %201, %202 : vector<8x32xf32>
    %204 = math.tanh %203 : vector<8x32xf32>
    %205 = arith.mulf %200, %204 : vector<8x32xf32>
    %206 = arith.index_cast %146 : i32 to index
    %c0_60 = arith.constant 0 : index
    %207 = vector.load %arg16[%206, %c0_60] : memref<64x32xf32, #tpu.memory_space<vmem>>, vector<8x32xf32>
    tpu.vector_store %arg16[%206, %c0_60], %205 {strides = array<i32>} : memref<64x32xf32, #tpu.memory_space<vmem>>, vector<8x32xf32>,
    %c3_i32 = arith.constant 3 : i32
    %c8_i32_61 = arith.constant 8 : i32
    %208 = arith.muli %c3_i32, %c8_i32_61 : i32
    %209 = tpu.assume_multiple %208, 8 : i32
    %210 = arith.index_cast %209 : i32 to index
    %c0_62 = arith.constant 0 : index
    %211 = vector.load %arg15[%210, %c0_62] : memref<64x128xf32, #tpu.memory_space<vmem>>, vector<8x128xf32>
    %cst_63 = arith.constant dense<0.000000e+00> : vector<8x128xf32>
    %212 = tpu.matmul %175, %7, %cst_63 {dimension_numbers = #tpu.dot_dimension_numbers<[1], [0], [0], [1], [0, 0, 1, 1], [], []>} : vector<8x32xf32>, vector<32x128xf32>, vector<8x128xf32> -> vector<8x128xf32>
    %213 = arith.addf %211, %212 : vector<8x128xf32>
    %214 = vector.extract_strided_slice %213 {offsets = [0, 0], sizes = [8, 32], strides = [1, 1]} : vector<8x128xf32> to vector<8x32xf32>
    %215 = arith.negf %214 : vector<8x32xf32>
    %216 = math.exp %215 : vector<8x32xf32>
    %cst_64 = arith.constant 1.000000e+00 : f32
    %217 = vector.broadcast %cst_64 : f32 to vector<8x32xf32>
    %218 = arith.addf %217, %216 : vector<8x32xf32>
    %219 = arith.divf %217, %218 : vector<8x32xf32>
    %220 = vector.extract_strided_slice %213 {offsets = [0, 32], sizes = [8, 32], strides = [1, 1]} : vector<8x128xf32> to vector<8x32xf32>
    %221 = arith.negf %220 : vector<8x32xf32>
    %222 = math.exp %221 : vector<8x32xf32>
    %cst_65 = arith.constant 1.000000e+00 : f32
    %223 = vector.broadcast %cst_65 : f32 to vector<8x32xf32>
    %224 = arith.addf %223, %222 : vector<8x32xf32>
    %225 = arith.divf %223, %224 : vector<8x32xf32>
    %226 = vector.extract_strided_slice %213 {offsets = [0, 64], sizes = [8, 32], strides = [1, 1]} : vector<8x128xf32> to vector<8x32xf32>
    %227 = math.tanh %226 : vector<8x32xf32>
    %228 = vector.extract_strided_slice %213 {offsets = [0, 96], sizes = [8, 32], strides = [1, 1]} : vector<8x128xf32> to vector<8x32xf32>
    %229 = arith.negf %228 : vector<8x32xf32>
    %230 = math.exp %229 : vector<8x32xf32>
    %cst_66 = arith.constant 1.000000e+00 : f32
    %231 = vector.broadcast %cst_66 : f32 to vector<8x32xf32>
    %232 = arith.addf %231, %230 : vector<8x32xf32>
    %233 = arith.divf %231, %232 : vector<8x32xf32>
    %234 = arith.mulf %225, %173 : vector<8x32xf32>
    %235 = arith.mulf %219, %227 : vector<8x32xf32>
    %236 = arith.addf %234, %235 : vector<8x32xf32>
    %237 = math.tanh %236 : vector<8x32xf32>
    %238 = arith.mulf %233, %237 : vector<8x32xf32>
    %cst_67 = arith.constant dense<0.000000e+00> : vector<8x128xf32>
    %239 = tpu.matmul %238, %8, %cst_67 {dimension_numbers = #tpu.dot_dimension_numbers<[1], [0], [0], [1], [0, 0, 1, 1], [], []>} : vector<8x32xf32>, vector<32x128xf32>, vector<8x128xf32> -> vector<8x128xf32>
    %cst_68 = arith.constant dense<0.000000e+00> : vector<8x128xf32>
    %240 = tpu.matmul %205, %9, %cst_68 {dimension_numbers = #tpu.dot_dimension_numbers<[1], [0], [0], [1], [0, 0, 1, 1], [], []>} : vector<8x32xf32>, vector<32x128xf32>, vector<8x128xf32> -> vector<8x128xf32>
    %241 = arith.addf %239, %240 : vector<8x128xf32>
    %242 = vector.broadcast %10 : vector<1x128xf32> to vector<8x128xf32>
    %243 = arith.addf %241, %242 : vector<8x128xf32>
    %244 = vector.extract_strided_slice %243 {offsets = [0, 0], sizes = [8, 32], strides = [1, 1]} : vector<8x128xf32> to vector<8x32xf32>
    %245 = arith.negf %244 : vector<8x32xf32>
    %246 = math.exp %245 : vector<8x32xf32>
    %cst_69 = arith.constant 1.000000e+00 : f32
    %247 = vector.broadcast %cst_69 : f32 to vector<8x32xf32>
    %248 = arith.addf %247, %246 : vector<8x32xf32>
    %249 = arith.divf %247, %248 : vector<8x32xf32>
    %250 = vector.extract_strided_slice %243 {offsets = [0, 32], sizes = [8, 32], strides = [1, 1]} : vector<8x128xf32> to vector<8x32xf32>
    %251 = arith.negf %250 : vector<8x32xf32>
    %252 = math.exp %251 : vector<8x32xf32>
    %cst_70 = arith.constant 1.000000e+00 : f32
    %253 = vector.broadcast %cst_70 : f32 to vector<8x32xf32>
    %254 = arith.addf %253, %252 : vector<8x32xf32>
    %255 = arith.divf %253, %254 : vector<8x32xf32>
    %256 = vector.extract_strided_slice %243 {offsets = [0, 64], sizes = [8, 32], strides = [1, 1]} : vector<8x128xf32> to vector<8x32xf32>
    %257 = math.tanh %256 : vector<8x32xf32>
    %258 = vector.extract_strided_slice %243 {offsets = [0, 96], sizes = [8, 32], strides = [1, 1]} : vector<8x128xf32> to vector<8x32xf32>
    %259 = arith.negf %258 : vector<8x32xf32>
    %260 = math.exp %259 : vector<8x32xf32>
    %cst_71 = arith.constant 1.000000e+00 : f32
    %261 = vector.broadcast %cst_71 : f32 to vector<8x32xf32>
    %262 = arith.addf %261, %260 : vector<8x32xf32>
    %263 = arith.divf %261, %262 : vector<8x32xf32>
    %264 = arith.mulf %255, %203 : vector<8x32xf32>
    %265 = arith.mulf %249, %257 : vector<8x32xf32>
    %266 = arith.addf %264, %265 : vector<8x32xf32>
    %267 = math.tanh %266 : vector<8x32xf32>
    %268 = arith.mulf %263, %267 : vector<8x32xf32>
    %269 = arith.index_cast %209 : i32 to index
    %c0_72 = arith.constant 0 : index
    %270 = vector.load %arg16[%269, %c0_72] : memref<64x32xf32, #tpu.memory_space<vmem>>, vector<8x32xf32>
    tpu.vector_store %arg16[%269, %c0_72], %268 {strides = array<i32>} : memref<64x32xf32, #tpu.memory_space<vmem>>, vector<8x32xf32>,
    %c4_i32 = arith.constant 4 : i32
    %c8_i32_73 = arith.constant 8 : i32
    %271 = arith.muli %c4_i32, %c8_i32_73 : i32
    %272 = tpu.assume_multiple %271, 8 : i32
    %273 = arith.index_cast %272 : i32 to index
    %c0_74 = arith.constant 0 : index
    %274 = vector.load %arg15[%273, %c0_74] : memref<64x128xf32, #tpu.memory_space<vmem>>, vector<8x128xf32>
    %cst_75 = arith.constant dense<0.000000e+00> : vector<8x128xf32>
    %275 = tpu.matmul %238, %7, %cst_75 {dimension_numbers = #tpu.dot_dimension_numbers<[1], [0], [0], [1], [0, 0, 1, 1], [], []>} : vector<8x32xf32>, vector<32x128xf32>, vector<8x128xf32> -> vector<8x128xf32>
    %276 = arith.addf %274, %275 : vector<8x128xf32>
    %277 = vector.extract_strided_slice %276 {offsets = [0, 0], sizes = [8, 32], strides = [1, 1]} : vector<8x128xf32> to vector<8x32xf32>
    %278 = arith.negf %277 : vector<8x32xf32>
    %279 = math.exp %278 : vector<8x32xf32>
    %cst_76 = arith.constant 1.000000e+00 : f32
    %280 = vector.broadcast %cst_76 : f32 to vector<8x32xf32>
    %281 = arith.addf %280, %279 : vector<8x32xf32>
    %282 = arith.divf %280, %281 : vector<8x32xf32>
    %283 = vector.extract_strided_slice %276 {offsets = [0, 32], sizes = [8, 32], strides = [1, 1]} : vector<8x128xf32> to vector<8x32xf32>
    %284 = arith.negf %283 : vector<8x32xf32>
    %285 = math.exp %284 : vector<8x32xf32>
    %cst_77 = arith.constant 1.000000e+00 : f32
    %286 = vector.broadcast %cst_77 : f32 to vector<8x32xf32>
    %287 = arith.addf %286, %285 : vector<8x32xf32>
    %288 = arith.divf %286, %287 : vector<8x32xf32>
    %289 = vector.extract_strided_slice %276 {offsets = [0, 64], sizes = [8, 32], strides = [1, 1]} : vector<8x128xf32> to vector<8x32xf32>
    %290 = math.tanh %289 : vector<8x32xf32>
    %291 = vector.extract_strided_slice %276 {offsets = [0, 96], sizes = [8, 32], strides = [1, 1]} : vector<8x128xf32> to vector<8x32xf32>
    %292 = arith.negf %291 : vector<8x32xf32>
    %293 = math.exp %292 : vector<8x32xf32>
    %cst_78 = arith.constant 1.000000e+00 : f32
    %294 = vector.broadcast %cst_78 : f32 to vector<8x32xf32>
    %295 = arith.addf %294, %293 : vector<8x32xf32>
    %296 = arith.divf %294, %295 : vector<8x32xf32>
    %297 = arith.mulf %288, %236 : vector<8x32xf32>
    %298 = arith.mulf %282, %290 : vector<8x32xf32>
    %299 = arith.addf %297, %298 : vector<8x32xf32>
    %300 = math.tanh %299 : vector<8x32xf32>
    %301 = arith.mulf %296, %300 : vector<8x32xf32>
    %cst_79 = arith.constant dense<0.000000e+00> : vector<8x128xf32>
    %302 = tpu.matmul %301, %8, %cst_79 {dimension_numbers = #tpu.dot_dimension_numbers<[1], [0], [0], [1], [0, 0, 1, 1], [], []>} : vector<8x32xf32>, vector<32x128xf32>, vector<8x128xf32> -> vector<8x128xf32>
    %cst_80 = arith.constant dense<0.000000e+00> : vector<8x128xf32>
    %303 = tpu.matmul %268, %9, %cst_80 {dimension_numbers = #tpu.dot_dimension_numbers<[1], [0], [0], [1], [0, 0, 1, 1], [], []>} : vector<8x32xf32>, vector<32x128xf32>, vector<8x128xf32> -> vector<8x128xf32>
    %304 = arith.addf %302, %303 : vector<8x128xf32>
    %305 = vector.broadcast %10 : vector<1x128xf32> to vector<8x128xf32>
    %306 = arith.addf %304, %305 : vector<8x128xf32>
    %307 = vector.extract_strided_slice %306 {offsets = [0, 0], sizes = [8, 32], strides = [1, 1]} : vector<8x128xf32> to vector<8x32xf32>
    %308 = arith.negf %307 : vector<8x32xf32>
    %309 = math.exp %308 : vector<8x32xf32>
    %cst_81 = arith.constant 1.000000e+00 : f32
    %310 = vector.broadcast %cst_81 : f32 to vector<8x32xf32>
    %311 = arith.addf %310, %309 : vector<8x32xf32>
    %312 = arith.divf %310, %311 : vector<8x32xf32>
    %313 = vector.extract_strided_slice %306 {offsets = [0, 32], sizes = [8, 32], strides = [1, 1]} : vector<8x128xf32> to vector<8x32xf32>
    %314 = arith.negf %313 : vector<8x32xf32>
    %315 = math.exp %314 : vector<8x32xf32>
    %cst_82 = arith.constant 1.000000e+00 : f32
    %316 = vector.broadcast %cst_82 : f32 to vector<8x32xf32>
    %317 = arith.addf %316, %315 : vector<8x32xf32>
    %318 = arith.divf %316, %317 : vector<8x32xf32>
    %319 = vector.extract_strided_slice %306 {offsets = [0, 64], sizes = [8, 32], strides = [1, 1]} : vector<8x128xf32> to vector<8x32xf32>
    %320 = math.tanh %319 : vector<8x32xf32>
    %321 = vector.extract_strided_slice %306 {offsets = [0, 96], sizes = [8, 32], strides = [1, 1]} : vector<8x128xf32> to vector<8x32xf32>
    %322 = arith.negf %321 : vector<8x32xf32>
    %323 = math.exp %322 : vector<8x32xf32>
    %cst_83 = arith.constant 1.000000e+00 : f32
    %324 = vector.broadcast %cst_83 : f32 to vector<8x32xf32>
    %325 = arith.addf %324, %323 : vector<8x32xf32>
    %326 = arith.divf %324, %325 : vector<8x32xf32>
    %327 = arith.mulf %318, %266 : vector<8x32xf32>
    %328 = arith.mulf %312, %320 : vector<8x32xf32>
    %329 = arith.addf %327, %328 : vector<8x32xf32>
    %330 = math.tanh %329 : vector<8x32xf32>
    %331 = arith.mulf %326, %330 : vector<8x32xf32>
    %332 = arith.index_cast %272 : i32 to index
    %c0_84 = arith.constant 0 : index
    %333 = vector.load %arg16[%332, %c0_84] : memref<64x32xf32, #tpu.memory_space<vmem>>, vector<8x32xf32>
    tpu.vector_store %arg16[%332, %c0_84], %331 {strides = array<i32>} : memref<64x32xf32, #tpu.memory_space<vmem>>, vector<8x32xf32>,
    %c5_i32 = arith.constant 5 : i32
    %c8_i32_85 = arith.constant 8 : i32
    %334 = arith.muli %c5_i32, %c8_i32_85 : i32
    %335 = tpu.assume_multiple %334, 8 : i32
    %336 = arith.index_cast %335 : i32 to index
    %c0_86 = arith.constant 0 : index
    %337 = vector.load %arg15[%336, %c0_86] : memref<64x128xf32, #tpu.memory_space<vmem>>, vector<8x128xf32>
    %cst_87 = arith.constant dense<0.000000e+00> : vector<8x128xf32>
    %338 = tpu.matmul %301, %7, %cst_87 {dimension_numbers = #tpu.dot_dimension_numbers<[1], [0], [0], [1], [0, 0, 1, 1], [], []>} : vector<8x32xf32>, vector<32x128xf32>, vector<8x128xf32> -> vector<8x128xf32>
    %339 = arith.addf %337, %338 : vector<8x128xf32>
    %340 = vector.extract_strided_slice %339 {offsets = [0, 0], sizes = [8, 32], strides = [1, 1]} : vector<8x128xf32> to vector<8x32xf32>
    %341 = arith.negf %340 : vector<8x32xf32>
    %342 = math.exp %341 : vector<8x32xf32>
    %cst_88 = arith.constant 1.000000e+00 : f32
    %343 = vector.broadcast %cst_88 : f32 to vector<8x32xf32>
    %344 = arith.addf %343, %342 : vector<8x32xf32>
    %345 = arith.divf %343, %344 : vector<8x32xf32>
    %346 = vector.extract_strided_slice %339 {offsets = [0, 32], sizes = [8, 32], strides = [1, 1]} : vector<8x128xf32> to vector<8x32xf32>
    %347 = arith.negf %346 : vector<8x32xf32>
    %348 = math.exp %347 : vector<8x32xf32>
    %cst_89 = arith.constant 1.000000e+00 : f32
    %349 = vector.broadcast %cst_89 : f32 to vector<8x32xf32>
    %350 = arith.addf %349, %348 : vector<8x32xf32>
    %351 = arith.divf %349, %350 : vector<8x32xf32>
    %352 = vector.extract_strided_slice %339 {offsets = [0, 64], sizes = [8, 32], strides = [1, 1]} : vector<8x128xf32> to vector<8x32xf32>
    %353 = math.tanh %352 : vector<8x32xf32>
    %354 = vector.extract_strided_slice %339 {offsets = [0, 96], sizes = [8, 32], strides = [1, 1]} : vector<8x128xf32> to vector<8x32xf32>
    %355 = arith.negf %354 : vector<8x32xf32>
    %356 = math.exp %355 : vector<8x32xf32>
    %cst_90 = arith.constant 1.000000e+00 : f32
    %357 = vector.broadcast %cst_90 : f32 to vector<8x32xf32>
    %358 = arith.addf %357, %356 : vector<8x32xf32>
    %359 = arith.divf %357, %358 : vector<8x32xf32>
    %360 = arith.mulf %351, %299 : vector<8x32xf32>
    %361 = arith.mulf %345, %353 : vector<8x32xf32>
    %362 = arith.addf %360, %361 : vector<8x32xf32>
    %363 = math.tanh %362 : vector<8x32xf32>
    %364 = arith.mulf %359, %363 : vector<8x32xf32>
    %cst_91 = arith.constant dense<0.000000e+00> : vector<8x128xf32>
    %365 = tpu.matmul %364, %8, %cst_91 {dimension_numbers = #tpu.dot_dimension_numbers<[1], [0], [0], [1], [0, 0, 1, 1], [], []>} : vector<8x32xf32>, vector<32x128xf32>, vector<8x128xf32> -> vector<8x128xf32>
    %cst_92 = arith.constant dense<0.000000e+00> : vector<8x128xf32>
    %366 = tpu.matmul %331, %9, %cst_92 {dimension_numbers = #tpu.dot_dimension_numbers<[1], [0], [0], [1], [0, 0, 1, 1], [], []>} : vector<8x32xf32>, vector<32x128xf32>, vector<8x128xf32> -> vector<8x128xf32>
    %367 = arith.addf %365, %366 : vector<8x128xf32>
    %368 = vector.broadcast %10 : vector<1x128xf32> to vector<8x128xf32>
    %369 = arith.addf %367, %368 : vector<8x128xf32>
    %370 = vector.extract_strided_slice %369 {offsets = [0, 0], sizes = [8, 32], strides = [1, 1]} : vector<8x128xf32> to vector<8x32xf32>
    %371 = arith.negf %370 : vector<8x32xf32>
    %372 = math.exp %371 : vector<8x32xf32>
    %cst_93 = arith.constant 1.000000e+00 : f32
    %373 = vector.broadcast %cst_93 : f32 to vector<8x32xf32>
    %374 = arith.addf %373, %372 : vector<8x32xf32>
    %375 = arith.divf %373, %374 : vector<8x32xf32>
    %376 = vector.extract_strided_slice %369 {offsets = [0, 32], sizes = [8, 32], strides = [1, 1]} : vector<8x128xf32> to vector<8x32xf32>
    %377 = arith.negf %376 : vector<8x32xf32>
    %378 = math.exp %377 : vector<8x32xf32>
    %cst_94 = arith.constant 1.000000e+00 : f32
    %379 = vector.broadcast %cst_94 : f32 to vector<8x32xf32>
    %380 = arith.addf %379, %378 : vector<8x32xf32>
    %381 = arith.divf %379, %380 : vector<8x32xf32>
    %382 = vector.extract_strided_slice %369 {offsets = [0, 64], sizes = [8, 32], strides = [1, 1]} : vector<8x128xf32> to vector<8x32xf32>
    %383 = math.tanh %382 : vector<8x32xf32>
    %384 = vector.extract_strided_slice %369 {offsets = [0, 96], sizes = [8, 32], strides = [1, 1]} : vector<8x128xf32> to vector<8x32xf32>
    %385 = arith.negf %384 : vector<8x32xf32>
    %386 = math.exp %385 : vector<8x32xf32>
    %cst_95 = arith.constant 1.000000e+00 : f32
    %387 = vector.broadcast %cst_95 : f32 to vector<8x32xf32>
    %388 = arith.addf %387, %386 : vector<8x32xf32>
    %389 = arith.divf %387, %388 : vector<8x32xf32>
    %390 = arith.mulf %381, %329 : vector<8x32xf32>
    %391 = arith.mulf %375, %383 : vector<8x32xf32>
    %392 = arith.addf %390, %391 : vector<8x32xf32>
    %393 = math.tanh %392 : vector<8x32xf32>
    %394 = arith.mulf %389, %393 : vector<8x32xf32>
    %395 = arith.index_cast %335 : i32 to index
    %c0_96 = arith.constant 0 : index
    %396 = vector.load %arg16[%395, %c0_96] : memref<64x32xf32, #tpu.memory_space<vmem>>, vector<8x32xf32>
    tpu.vector_store %arg16[%395, %c0_96], %394 {strides = array<i32>} : memref<64x32xf32, #tpu.memory_space<vmem>>, vector<8x32xf32>,
    %c6_i32 = arith.constant 6 : i32
    %c8_i32_97 = arith.constant 8 : i32
    %397 = arith.muli %c6_i32, %c8_i32_97 : i32
    %398 = tpu.assume_multiple %397, 8 : i32
    %399 = arith.index_cast %398 : i32 to index
    %c0_98 = arith.constant 0 : index
    %400 = vector.load %arg15[%399, %c0_98] : memref<64x128xf32, #tpu.memory_space<vmem>>, vector<8x128xf32>
    %cst_99 = arith.constant dense<0.000000e+00> : vector<8x128xf32>
    %401 = tpu.matmul %364, %7, %cst_99 {dimension_numbers = #tpu.dot_dimension_numbers<[1], [0], [0], [1], [0, 0, 1, 1], [], []>} : vector<8x32xf32>, vector<32x128xf32>, vector<8x128xf32> -> vector<8x128xf32>
    %402 = arith.addf %400, %401 : vector<8x128xf32>
    %403 = vector.extract_strided_slice %402 {offsets = [0, 0], sizes = [8, 32], strides = [1, 1]} : vector<8x128xf32> to vector<8x32xf32>
    %404 = arith.negf %403 : vector<8x32xf32>
    %405 = math.exp %404 : vector<8x32xf32>
    %cst_100 = arith.constant 1.000000e+00 : f32
    %406 = vector.broadcast %cst_100 : f32 to vector<8x32xf32>
    %407 = arith.addf %406, %405 : vector<8x32xf32>
    %408 = arith.divf %406, %407 : vector<8x32xf32>
    %409 = vector.extract_strided_slice %402 {offsets = [0, 32], sizes = [8, 32], strides = [1, 1]} : vector<8x128xf32> to vector<8x32xf32>
    %410 = arith.negf %409 : vector<8x32xf32>
    %411 = math.exp %410 : vector<8x32xf32>
    %cst_101 = arith.constant 1.000000e+00 : f32
    %412 = vector.broadcast %cst_101 : f32 to vector<8x32xf32>
    %413 = arith.addf %412, %411 : vector<8x32xf32>
    %414 = arith.divf %412, %413 : vector<8x32xf32>
    %415 = vector.extract_strided_slice %402 {offsets = [0, 64], sizes = [8, 32], strides = [1, 1]} : vector<8x128xf32> to vector<8x32xf32>
    %416 = math.tanh %415 : vector<8x32xf32>
    %417 = vector.extract_strided_slice %402 {offsets = [0, 96], sizes = [8, 32], strides = [1, 1]} : vector<8x128xf32> to vector<8x32xf32>
    %418 = arith.negf %417 : vector<8x32xf32>
    %419 = math.exp %418 : vector<8x32xf32>
    %cst_102 = arith.constant 1.000000e+00 : f32
    %420 = vector.broadcast %cst_102 : f32 to vector<8x32xf32>
    %421 = arith.addf %420, %419 : vector<8x32xf32>
    %422 = arith.divf %420, %421 : vector<8x32xf32>
    %423 = arith.mulf %414, %362 : vector<8x32xf32>
    %424 = arith.mulf %408, %416 : vector<8x32xf32>
    %425 = arith.addf %423, %424 : vector<8x32xf32>
    %426 = math.tanh %425 : vector<8x32xf32>
    %427 = arith.mulf %422, %426 : vector<8x32xf32>
    %cst_103 = arith.constant dense<0.000000e+00> : vector<8x128xf32>
    %428 = tpu.matmul %427, %8, %cst_103 {dimension_numbers = #tpu.dot_dimension_numbers<[1], [0], [0], [1], [0, 0, 1, 1], [], []>} : vector<8x32xf32>, vector<32x128xf32>, vector<8x128xf32> -> vector<8x128xf32>
    %cst_104 = arith.constant dense<0.000000e+00> : vector<8x128xf32>
    %429 = tpu.matmul %394, %9, %cst_104 {dimension_numbers = #tpu.dot_dimension_numbers<[1], [0], [0], [1], [0, 0, 1, 1], [], []>} : vector<8x32xf32>, vector<32x128xf32>, vector<8x128xf32> -> vector<8x128xf32>
    %430 = arith.addf %428, %429 : vector<8x128xf32>
    %431 = vector.broadcast %10 : vector<1x128xf32> to vector<8x128xf32>
    %432 = arith.addf %430, %431 : vector<8x128xf32>
    %433 = vector.extract_strided_slice %432 {offsets = [0, 0], sizes = [8, 32], strides = [1, 1]} : vector<8x128xf32> to vector<8x32xf32>
    %434 = arith.negf %433 : vector<8x32xf32>
    %435 = math.exp %434 : vector<8x32xf32>
    %cst_105 = arith.constant 1.000000e+00 : f32
    %436 = vector.broadcast %cst_105 : f32 to vector<8x32xf32>
    %437 = arith.addf %436, %435 : vector<8x32xf32>
    %438 = arith.divf %436, %437 : vector<8x32xf32>
    %439 = vector.extract_strided_slice %432 {offsets = [0, 32], sizes = [8, 32], strides = [1, 1]} : vector<8x128xf32> to vector<8x32xf32>
    %440 = arith.negf %439 : vector<8x32xf32>
    %441 = math.exp %440 : vector<8x32xf32>
    %cst_106 = arith.constant 1.000000e+00 : f32
    %442 = vector.broadcast %cst_106 : f32 to vector<8x32xf32>
    %443 = arith.addf %442, %441 : vector<8x32xf32>
    %444 = arith.divf %442, %443 : vector<8x32xf32>
    %445 = vector.extract_strided_slice %432 {offsets = [0, 64], sizes = [8, 32], strides = [1, 1]} : vector<8x128xf32> to vector<8x32xf32>
    %446 = math.tanh %445 : vector<8x32xf32>
    %447 = vector.extract_strided_slice %432 {offsets = [0, 96], sizes = [8, 32], strides = [1, 1]} : vector<8x128xf32> to vector<8x32xf32>
    %448 = arith.negf %447 : vector<8x32xf32>
    %449 = math.exp %448 : vector<8x32xf32>
    %cst_107 = arith.constant 1.000000e+00 : f32
    %450 = vector.broadcast %cst_107 : f32 to vector<8x32xf32>
    %451 = arith.addf %450, %449 : vector<8x32xf32>
    %452 = arith.divf %450, %451 : vector<8x32xf32>
    %453 = arith.mulf %444, %392 : vector<8x32xf32>
    %454 = arith.mulf %438, %446 : vector<8x32xf32>
    %455 = arith.addf %453, %454 : vector<8x32xf32>
    %456 = math.tanh %455 : vector<8x32xf32>
    %457 = arith.mulf %452, %456 : vector<8x32xf32>
    %458 = arith.index_cast %398 : i32 to index
    %c0_108 = arith.constant 0 : index
    %459 = vector.load %arg16[%458, %c0_108] : memref<64x32xf32, #tpu.memory_space<vmem>>, vector<8x32xf32>
    tpu.vector_store %arg16[%458, %c0_108], %457 {strides = array<i32>} : memref<64x32xf32, #tpu.memory_space<vmem>>, vector<8x32xf32>,
    %c7_i32 = arith.constant 7 : i32
    %c8_i32_109 = arith.constant 8 : i32
    %460 = arith.muli %c7_i32, %c8_i32_109 : i32
    %461 = tpu.assume_multiple %460, 8 : i32
    %462 = arith.index_cast %461 : i32 to index
    %c0_110 = arith.constant 0 : index
    %463 = vector.load %arg15[%462, %c0_110] : memref<64x128xf32, #tpu.memory_space<vmem>>, vector<8x128xf32>
    %cst_111 = arith.constant dense<0.000000e+00> : vector<8x128xf32>
    %464 = tpu.matmul %427, %7, %cst_111 {dimension_numbers = #tpu.dot_dimension_numbers<[1], [0], [0], [1], [0, 0, 1, 1], [], []>} : vector<8x32xf32>, vector<32x128xf32>, vector<8x128xf32> -> vector<8x128xf32>
    %465 = arith.addf %463, %464 : vector<8x128xf32>
    %466 = vector.extract_strided_slice %465 {offsets = [0, 0], sizes = [8, 32], strides = [1, 1]} : vector<8x128xf32> to vector<8x32xf32>
    %467 = arith.negf %466 : vector<8x32xf32>
    %468 = math.exp %467 : vector<8x32xf32>
    %cst_112 = arith.constant 1.000000e+00 : f32
    %469 = vector.broadcast %cst_112 : f32 to vector<8x32xf32>
    %470 = arith.addf %469, %468 : vector<8x32xf32>
    %471 = arith.divf %469, %470 : vector<8x32xf32>
    %472 = vector.extract_strided_slice %465 {offsets = [0, 32], sizes = [8, 32], strides = [1, 1]} : vector<8x128xf32> to vector<8x32xf32>
    %473 = arith.negf %472 : vector<8x32xf32>
    %474 = math.exp %473 : vector<8x32xf32>
    %cst_113 = arith.constant 1.000000e+00 : f32
    %475 = vector.broadcast %cst_113 : f32 to vector<8x32xf32>
    %476 = arith.addf %475, %474 : vector<8x32xf32>
    %477 = arith.divf %475, %476 : vector<8x32xf32>
    %478 = vector.extract_strided_slice %465 {offsets = [0, 64], sizes = [8, 32], strides = [1, 1]} : vector<8x128xf32> to vector<8x32xf32>
    %479 = math.tanh %478 : vector<8x32xf32>
    %480 = vector.extract_strided_slice %465 {offsets = [0, 96], sizes = [8, 32], strides = [1, 1]} : vector<8x128xf32> to vector<8x32xf32>
    %481 = arith.negf %480 : vector<8x32xf32>
    %482 = math.exp %481 : vector<8x32xf32>
    %cst_114 = arith.constant 1.000000e+00 : f32
    %483 = vector.broadcast %cst_114 : f32 to vector<8x32xf32>
    %484 = arith.addf %483, %482 : vector<8x32xf32>
    %485 = arith.divf %483, %484 : vector<8x32xf32>
    %486 = arith.mulf %477, %425 : vector<8x32xf32>
    %487 = arith.mulf %471, %479 : vector<8x32xf32>
    %488 = arith.addf %486, %487 : vector<8x32xf32>
    %489 = math.tanh %488 : vector<8x32xf32>
    %490 = arith.mulf %485, %489 : vector<8x32xf32>
    %cst_115 = arith.constant dense<0.000000e+00> : vector<8x128xf32>
    %491 = tpu.matmul %490, %8, %cst_115 {dimension_numbers = #tpu.dot_dimension_numbers<[1], [0], [0], [1], [0, 0, 1, 1], [], []>} : vector<8x32xf32>, vector<32x128xf32>, vector<8x128xf32> -> vector<8x128xf32>
    %cst_116 = arith.constant dense<0.000000e+00> : vector<8x128xf32>
    %492 = tpu.matmul %457, %9, %cst_116 {dimension_numbers = #tpu.dot_dimension_numbers<[1], [0], [0], [1], [0, 0, 1, 1], [], []>} : vector<8x32xf32>, vector<32x128xf32>, vector<8x128xf32> -> vector<8x128xf32>
    %493 = arith.addf %491, %492 : vector<8x128xf32>
    %494 = vector.broadcast %10 : vector<1x128xf32> to vector<8x128xf32>
    %495 = arith.addf %493, %494 : vector<8x128xf32>
    %496 = vector.extract_strided_slice %495 {offsets = [0, 0], sizes = [8, 32], strides = [1, 1]} : vector<8x128xf32> to vector<8x32xf32>
    %497 = arith.negf %496 : vector<8x32xf32>
    %498 = math.exp %497 : vector<8x32xf32>
    %cst_117 = arith.constant 1.000000e+00 : f32
    %499 = vector.broadcast %cst_117 : f32 to vector<8x32xf32>
    %500 = arith.addf %499, %498 : vector<8x32xf32>
    %501 = arith.divf %499, %500 : vector<8x32xf32>
    %502 = vector.extract_strided_slice %495 {offsets = [0, 32], sizes = [8, 32], strides = [1, 1]} : vector<8x128xf32> to vector<8x32xf32>
    %503 = arith.negf %502 : vector<8x32xf32>
    %504 = math.exp %503 : vector<8x32xf32>
    %cst_118 = arith.constant 1.000000e+00 : f32
    %505 = vector.broadcast %cst_118 : f32 to vector<8x32xf32>
    %506 = arith.addf %505, %504 : vector<8x32xf32>
    %507 = arith.divf %505, %506 : vector<8x32xf32>
    %508 = vector.extract_strided_slice %495 {offsets = [0, 64], sizes = [8, 32], strides = [1, 1]} : vector<8x128xf32> to vector<8x32xf32>
    %509 = math.tanh %508 : vector<8x32xf32>
    %510 = vector.extract_strided_slice %495 {offsets = [0, 96], sizes = [8, 32], strides = [1, 1]} : vector<8x128xf32> to vector<8x32xf32>
    %511 = arith.negf %510 : vector<8x32xf32>
    %512 = math.exp %511 : vector<8x32xf32>
    %cst_119 = arith.constant 1.000000e+00 : f32
    %513 = vector.broadcast %cst_119 : f32 to vector<8x32xf32>
    %514 = arith.addf %513, %512 : vector<8x32xf32>
    %515 = arith.divf %513, %514 : vector<8x32xf32>
    %516 = arith.mulf %507, %455 : vector<8x32xf32>
    %517 = arith.mulf %501, %509 : vector<8x32xf32>
    %518 = arith.addf %516, %517 : vector<8x32xf32>
    %519 = math.tanh %518 : vector<8x32xf32>
    %520 = arith.mulf %515, %519 : vector<8x32xf32>
    %521 = arith.index_cast %461 : i32 to index
    %c0_120 = arith.constant 0 : index
    %522 = vector.load %arg16[%521, %c0_120] : memref<64x32xf32, #tpu.memory_space<vmem>>, vector<8x32xf32>
    tpu.vector_store %arg16[%521, %c0_120], %520 {strides = array<i32>} : memref<64x32xf32, #tpu.memory_space<vmem>>, vector<8x32xf32>,
    %c8_i32_121 = arith.constant 8 : i32
    %c0_122 = arith.constant 0 : index
    %c0_123 = arith.constant 0 : index
    %c0_124 = arith.constant 0 : index
    %523 = vector.load %arg13[%c0_122, %c0_123, %c0_124] : memref<2x8x32xf32, #tpu.memory_space<vmem>>, vector<1x8x32xf32>
    %524 = vector.shape_cast %523 : vector<1x8x32xf32> to vector<8x32xf32>
    %525 = vector.shape_cast %490 : vector<8x32xf32> to vector<1x8x32xf32>
    tpu.vector_store %arg13[%c0_122, %c0_123, %c0_124], %525 {strides = array<i32>} : memref<2x8x32xf32, #tpu.memory_space<vmem>>, vector<1x8x32xf32>,
    %c1_125 = arith.constant 1 : index
    %c0_126 = arith.constant 0 : index
    %c0_127 = arith.constant 0 : index
    %526 = vector.load %arg13[%c1_125, %c0_126, %c0_127] : memref<2x8x32xf32, #tpu.memory_space<vmem>>, vector<1x8x32xf32>
    %527 = vector.shape_cast %526 : vector<1x8x32xf32> to vector<8x32xf32>
    %528 = vector.shape_cast %520 : vector<8x32xf32> to vector<1x8x32xf32>
    tpu.vector_store %arg13[%c1_125, %c0_126, %c0_127], %528 {strides = array<i32>} : memref<2x8x32xf32, #tpu.memory_space<vmem>>, vector<1x8x32xf32>,
    %c0_128 = arith.constant 0 : index
    %c0_129 = arith.constant 0 : index
    %c0_130 = arith.constant 0 : index
    %529 = vector.load %arg14[%c0_128, %c0_129, %c0_130] : memref<2x8x32xf32, #tpu.memory_space<vmem>>, vector<1x8x32xf32>
    %530 = vector.shape_cast %529 : vector<1x8x32xf32> to vector<8x32xf32>
    %531 = vector.shape_cast %488 : vector<8x32xf32> to vector<1x8x32xf32>
    tpu.vector_store %arg14[%c0_128, %c0_129, %c0_130], %531 {strides = array<i32>} : memref<2x8x32xf32, #tpu.memory_space<vmem>>, vector<1x8x32xf32>,
    %c1_131 = arith.constant 1 : index
    %c0_132 = arith.constant 0 : index
    %c0_133 = arith.constant 0 : index
    %532 = vector.load %arg14[%c1_131, %c0_132, %c0_133] : memref<2x8x32xf32, #tpu.memory_space<vmem>>, vector<1x8x32xf32>
    %533 = vector.shape_cast %532 : vector<1x8x32xf32> to vector<8x32xf32>
    %534 = vector.shape_cast %518 : vector<8x32xf32> to vector<1x8x32xf32>
    tpu.vector_store %arg14[%c1_131, %c0_132, %c0_133], %534 {strides = array<i32>} : memref<2x8x32xf32, #tpu.memory_space<vmem>>, vector<1x8x32xf32>,
    %c0_134 = arith.constant 0 : index
    %c0_135 = arith.constant 0 : index
    %535 = vector.load %arg16[%c0_134, %c0_135] : memref<64x32xf32, #tpu.memory_space<vmem>>, vector<64x32xf32>
    %c0_136 = arith.constant 0 : index
    %c0_137 = arith.constant 0 : index
    %536 = vector.load %arg10[%c0_136, %c0_137] : memref<32x32xf32, #tpu.memory_space<vmem>>, vector<32x32xf32>
    %cst_138 = arith.constant dense<0.000000e+00> : vector<64x32xf32>
    %537 = tpu.matmul %535, %536, %cst_138 {dimension_numbers = #tpu.dot_dimension_numbers<[1], [0], [0], [1], [0, 0, 1, 1], [], []>} : vector<64x32xf32>, vector<32x32xf32>, vector<64x32xf32> -> vector<64x32xf32>
    %c0_139 = arith.constant 0 : index
    %c0_140 = arith.constant 0 : index
    %538 = vector.load %arg11[%c0_139, %c0_140] : memref<1x32xf32, #tpu.memory_space<vmem>>, vector<1x32xf32>
    %539 = vector.broadcast %538 : vector<1x32xf32> to vector<64x32xf32>
    %540 = arith.addf %537, %539 : vector<64x32xf32>
    %cst_141 = arith.constant dense<0xFF800000> : vector<64xf32>
    %541 = vector.multi_reduction <maximumf>, %540, %cst_141 [1] : vector<64x32xf32> to vector<64xf32>
    %542 = vector.shape_cast %541 : vector<64xf32> to vector<64x1xf32>
    %543 = vector.broadcast %542 : vector<64x1xf32> to vector<64x32xf32>
    %544 = arith.subf %540, %543 : vector<64x32xf32>
    %545 = math.exp %544 : vector<64x32xf32>
    %cst_142 = arith.constant dense<0.000000e+00> : vector<64xf32>
    %546 = vector.multi_reduction <add>, %545, %cst_142 [1] : vector<64x32xf32> to vector<64xf32>
    %547 = vector.shape_cast %546 : vector<64xf32> to vector<64x1xf32>
    %548 = math.log %547 : vector<64x1xf32>
    %549 = vector.broadcast %548 : vector<64x1xf32> to vector<64x32xf32>
    %550 = arith.subf %544, %549 : vector<64x32xf32>
    %c0_143 = arith.constant 0 : index
    %c0_144 = arith.constant 0 : index
    %551 = vector.load %arg12[%c0_143, %c0_144] : memref<64x32xf32, #tpu.memory_space<vmem>>, vector<64x32xf32>
    tpu.vector_store %arg12[%c0_143, %c0_144], %550 {strides = array<i32>} : memref<64x32xf32, #tpu.memory_space<vmem>>, vector<64x32xf32>,
    return
  }
  func.func @transform_0(%arg0: i32) -> (i32, i32) {
    %c0_i32 = arith.constant 0 : i32
    %c0_i32_0 = arith.constant 0 : i32
    %c0_i32_1 = arith.constant 0 : i32
    return %c0_i32, %c0_i32_0 : i32, i32
  }
  func.func @transform_1(%arg0: i32) -> (i32, i32, i32) {
    %c0_i32 = arith.constant 0 : i32
    %c0_i32_0 = arith.constant 0 : i32
    %c0_i32_1 = arith.constant 0 : i32
    %c0_i32_2 = arith.constant 0 : i32
    return %c0_i32, %c0_i32_0, %c0_i32_1 : i32, i32, i32
  }
  func.func @transform_2(%arg0: i32) -> (i32, i32, i32) {
    %c0_i32 = arith.constant 0 : i32
    %c0_i32_0 = arith.constant 0 : i32
    %c0_i32_1 = arith.constant 0 : i32
    %c0_i32_2 = arith.constant 0 : i32
    return %c0_i32, %c0_i32_0, %c0_i32_1 : i32, i32, i32
  }
  func.func @transform_3(%arg0: i32) -> (i32, i32) {
    %c0_i32 = arith.constant 0 : i32
    %c0_i32_0 = arith.constant 0 : i32
    %c0_i32_1 = arith.constant 0 : i32
    return %c0_i32, %c0_i32_0 : i32, i32
  }
  func.func @transform_4(%arg0: i32) -> (i32, i32) {
    %c0_i32 = arith.constant 0 : i32
    %c0_i32_0 = arith.constant 0 : i32
    %c0_i32_1 = arith.constant 0 : i32
    return %c0_i32, %c0_i32_0 : i32, i32
  }
  func.func @transform_5(%arg0: i32) -> (i32, i32) {
    %c0_i32 = arith.constant 0 : i32
    %c0_i32_0 = arith.constant 0 : i32
    %c0_i32_1 = arith.constant 0 : i32
    return %c0_i32, %c0_i32_0 : i32, i32
  }
  func.func @transform_6(%arg0: i32) -> (i32, i32) {
    %c0_i32 = arith.constant 0 : i32
    %c0_i32_0 = arith.constant 0 : i32
    %c0_i32_1 = arith.constant 0 : i32
    return %c0_i32, %c0_i32_0 : i32, i32
  }
  func.func @transform_7(%arg0: i32) -> (i32, i32) {
    %c0_i32 = arith.constant 0 : i32
    %c0_i32_0 = arith.constant 0 : i32
    %c0_i32_1 = arith.constant 0 : i32
    return %c0_i32, %c0_i32_0 : i32, i32
  }
  func.func @transform_8(%arg0: i32) -> (i32, i32) {
    %c0_i32 = arith.constant 0 : i32
    %c0_i32_0 = arith.constant 0 : i32
    %c0_i32_1 = arith.constant 0 : i32
    return %c0_i32, %c0_i32_0 : i32, i32
  }
  func.func @transform_9(%arg0: i32) -> (i32, i32) {
    %c0_i32 = arith.constant 0 : i32
    %c0_i32_0 = arith.constant 0 : i32
    %c0_i32_1 = arith.constant 0 : i32
    return %c0_i32, %c0_i32_0 : i32, i32
  }
  func.func @transform_10(%arg0: i32) -> (i32, i32) {
    %c0_i32 = arith.constant 0 : i32
    %c0_i32_0 = arith.constant 0 : i32
    %c0_i32_1 = arith.constant 0 : i32
    return %c0_i32, %c0_i32_0 : i32, i32
  }
  func.func @transform_11(%arg0: i32) -> (i32, i32) {
    %c0_i32 = arith.constant 0 : i32
    %c0_i32_0 = arith.constant 0 : i32
    %c0_i32_1 = arith.constant 0 : i32
    return %c0_i32, %c0_i32_0 : i32, i32
  }
  func.func @transform_12(%arg0: i32) -> (i32, i32, i32) {
    %c0_i32 = arith.constant 0 : i32
    %c0_i32_0 = arith.constant 0 : i32
    %c0_i32_1 = arith.constant 0 : i32
    %c0_i32_2 = arith.constant 0 : i32
    return %c0_i32, %c0_i32_0, %c0_i32_1 : i32, i32, i32
  }
  func.func @transform_13(%arg0: i32) -> (i32, i32, i32) {
    %c0_i32 = arith.constant 0 : i32
    %c0_i32_0 = arith.constant 0 : i32
    %c0_i32_1 = arith.constant 0 : i32
    %c0_i32_2 = arith.constant 0 : i32
    return %c0_i32, %c0_i32_0, %c0_i32_1 : i32, i32, i32
  }
}

</mosaic_0001>

<bundles_post_ra>
// kernel: lstm_module_forward.1
= control target key start
LH: loop header
LB: loop body
LE: loop exit
PB: predicated region body
PF: predicated region fallthrough
CT: control target
= control target key end

     0   :  { %vm59_vm0 = vcmask 195584   ;;  %v3548_v14 = vmov 0.0|0.0   ;;  %vm3549_vm1 = vmmov 0   ;;  %v3550_v17 = vmov 0.0   ;;  %s3551_s19 = smov 64   ;;  %s3553_s27 = smov 96   ;;  %s4201_s3 = inlined_call_operand.vmem [shape: f32[24,128], index: 3, kind: input, shape index: {}]   ;;  %s4202_s0 = inlined_call_operand.vmem [shape: f32[64,24], index: 0, kind: input, shape index: {}]   ;;  %s4203_s4 = inlined_call_operand.vmem [shape: f32[32,128], index: 4, kind: input, shape index: {}]   ;;  %s4204_s1 = inlined_call_operand.vmem [shape: f32[2,8,32], index: 1, kind: input, shape index: {}]   ;;  %s4205_s5 = inlined_call_operand.vmem [shape: f32[1,128], index: 5, kind: input, shape index: {}]   ;;  %s4206_s2 = inlined_call_operand.vmem [shape: f32[2,8,32], index: 2, kind: input, shape index: {}]   ;;  %s4207_s7 = inlined_call_operand.vmem [shape: f32[32,128], index: 7, kind: input, shape index: {}]   ;;  %s4208_s6 = inlined_call_operand.vmem [shape: f32[32,128], index: 6, kind: input, shape index: {}]   ;;  %s4209_s8 = inlined_call_operand.vmem [shape: f32[1,128], index: 8, kind: input, shape index: {}]   ;;  %s4210_s9 = inlined_call_operand.vmem [shape: f32[32,32], index: 9, kind: input, shape index: {}]   ;;  %s4211_s12 = inlined_call_operand.vmem [shape: f32[2,8,32], index: 12, kind: output, shape index: {1}]   ;;  %s4212_s10 = inlined_call_operand.vmem [shape: f32[1,32], index: 10, kind: input, shape index: {}]   ;;  %s4213_s11 = inlined_call_operand.vmem [shape: f32[64,32], index: 11, kind: output, shape index: {0}]   ;;  %s4214_s13 = inlined_call_operand.vmem [shape: f32[2,8,32], index: 13, kind: output, shape index: {2}]  }
   0x1   :  { %v49_v0 = vld [vmem:[%s4201_s3] sm:$0xff]  ;;  %v50_v1 = vld [vmem:[%s4201_s3 + $0x8] sm:$0xff]  ;;  %v51_v4 = vld [vmem:[%s4201_s3 + $0x10] sm:$0xff]  ;;  %vm217_vm2 = vcmask 261120   ;;  %s3552_s3 = smov 32  }
   0x2   :  { %v3220_v2 = vpack.c.bf16 %v50_v1, %v49_v0  ;;  %v45_v3 = vld [vmem:[%s4202_s0 + $0x20] sm:$0xff]  ;;  %v198_v6 = vld [vmem:[%s4203_s4 + $0x8] sm:$0xff]  ;;  %v47_v10 = vld [vmem:[%s4202_s0 + $0x30] sm:$0xff] }
   0x3   :  { %2930 = vmatprep.mubr.msk.f32.mxu1 %vm59_vm0, %v45_v3  ;;  %v197_v5 = vld [vmem:[%s4203_s4] sm:$0xff]  ;;  %v46_v8 = vld [vmem:[%s4202_s0 + $0x28] sm:$0xff]  ;;  %v199_v11 = vld [vmem:[%s4203_s4 + $0x10] sm:$0xff] }
   0x4   :  { %3376 = vmatprep.subr.bf16.mxu1 %v3220_v2  ;;  %3221 = vmatprep.subr.bf16.mxu0 %v3220_v2  ;;  %v41_v7 = vld [vmem:[%s4202_s0] sm:$0xff]  ;;  %v3649_v9 = vpack.c.bf16 %v198_v6, %v197_v5  ;;  %v200_v12 = vld [vmem:[%s4203_s4 + $0x18] sm:$0xff]  ;;  %v42_v13 = vld [vmem:[%s4202_s0 + $0x8] sm:$0xff] }
   0x5   :  { %3378 = vmatpush3.bf16.msra.mxu1 %v3220_v2  ;;  %3223 = vmatpush3.bf16.msra.mxu0 %v3220_v2  ;;  %v48_v15 = vld [vmem:[%s4202_s0 + $0x38] sm:$0xff]  ;;  %v3671_v16 = vpack.c.bf16 %v200_v12, %v199_v11  ;;  %v210_v18 = vld [vmem:[%s4204_s1] sm:$0xff]  ;;  %v43_v42 = vld [vmem:[%s4202_s0 + $0x10] sm:$0xff] }
   0x6   :  { %3377 = vmatprep.subr.mxu1 %v51_v4  ;;  %2922 = vmatprep.subr.mxu0 %v51_v4  ;;  %v3696_v23 = vld [vmem:[%s4205_s5] ss:$0 sm:$0xff]  ;;  %v44_v43 = vld [vmem:[%s4202_s0 + $0x18] sm:$0xff]  ;;  %v206_v45 = vld [vmem:[%s4207_s7 + $0x8] sm:$0xff] }
   0x7   :  { %2924 = vmatprep.mubr.msk.f32.mxu0 %vm59_vm0, %v41_v7  ;;  %v211_v31 = vld [vmem:[%s4206_s2] sm:$0xff]  ;;  %v207_v46 = vld [vmem:[%s4207_s7 + $0x10] sm:$0xff]  ;;  %v208_v48 = vld [vmem:[%s4207_s7 + $0x18] sm:$0xff] }
   0x8   :  { %v205_v44 = vld [vmem:[%s4207_s7] sm:$0xff]  ;;  %v202_v50 = vld [vmem:[%s4208_s6 + $0x8] sm:$0xff]  ;;  %v203_v52 = vld [vmem:[%s4208_s6 + $0x10] sm:$0xff]  ;;  %v3751_v54 = vpack.c.bf16 %v208_v48, %v207_v46 }
   0x9   :  { %3379 = vmatpush3.msra.mxu1 %v51_v4  ;;  %2923 = vmatpush3.msra.mxu0 %v51_v4  ;;  %v3728_v47 = vpack.c.bf16 %v206_v45, %v205_v44  ;;  %v201_v49 = vld [vmem:[%s4208_s6] sm:$0xff]  ;;  %v204_v53 = vld [vmem:[%s4208_s6 + $0x18] sm:$0xff]  ;;  %v2721_v56 = vld [vmem:[%s4204_s1 + $0x8] sm:$0xff] }
   0xa   :  { %2931 = vmatmul.mubr.msk.f32.vlgmr.msra.gmra.mrb[0].mxu1 %vm59_vm0, %v46_v8  ;;  %3224 = vmatprep.subr.bf16.mxu1 %v3548_v14  ;;  %v3740_v51 = vpack.c.bf16 %v202_v50, %v201_v49  ;;  %v3755_v55 = vpack.c.bf16 %v204_v53, %v203_v52  ;;  %v3797_v2 = vld [vmem:[%s4209_s8] ss:$0 sm:$0xff] }
   0xb   :  { %3226 = vmatpush3.bf16.msra.mxu1 %v3649_v9  ;;  %2933 = vmatprep.mubr.msk.f32.mxu1 %vm59_vm0, %v47_v10 }
   0xc   :  { %3227 = vmatprep.subr.bf16.mxu1 %v3548_v14  ;;  %2925 = vmatmul.mubr.msk.f32.vlgmr.msra.gmra.mrb[0].mxu0 %vm59_vm0, %v42_v13  ;;  %v2722_v13 = vld [vmem:[%s4206_s2 + $0x8] sm:$0xff] }
   0xd   :  { %3236 = vmatprep.subr.bf16.mxu0 %v3548_v14  ;;  %2927 = vmatprep.mubr.msk.f32.mxu0 %vm59_vm0, %v43_v42 }
   0xe   :  { %2934 = vmatmul.mubr.msk.f32.gmra.mrb[2].mxu1 %vm59_vm0, %v48_v15  ;;  %3238 = vmatpush3.bf16.msra.mxu0 %v3740_v51 }
   0xf   :  { %3229 = vmatpush3.bf16.msra.mxu1 %v3671_v16  ;;  %2944 = vmatprep.mubr.msk.f32.mxu1 %vm3549_vm1, %v3550_v17 }
  0x10   :  { %3230 = vmatprep.subr.bf16.mxu1 %v3548_v14  ;;  %2928 = vmatmul.mubr.msk.f32.gmra.mrb[2].mxu0 %vm59_vm0, %v44_v43 }
  0x11   :  { %2966 = vmatprep.mubr.msk.f32.mxu0 %vm3549_vm1, %v3550_v17  ;;  %3239 = vmatprep.subr.bf16.mxu0 %v3548_v14 }
  0x12   :  { %2945 = vmatmul.mubr.msk.f32.vlgmr.msra.gmra.mrb[4].mxu1 %vm217_vm2, %v210_v18  ;;  %3241 = vmatpush3.bf16.msra.mxu0 %v3755_v55 }
  0x13   :  { %2955 = vmatprep.mubr.msk.f32.mxu1 %vm3549_vm1, %v3550_v17  ;;  %3232 = vmatpush3.bf16.msra.mxu1 %v3728_v47 }
  0x14   :  { %3233 = vmatprep.subr.bf16.mxu1 %v3548_v14  ;;  %3248 = vmatprep.subr.bf16.mxu0 %v3548_v14 }
  0x17   :  { %3235 = vmatpush3.bf16.msra.mxu1 %v3751_v54 }
  0x18   :  { %3242 = vmatprep.subr.bf16.mxu1 %v3548_v14 }
  0x1a   :  { %2956 = vmatmul.mubr.msk.f32.vlgmr.msra.gmra.mrb[6].mxu1 %vm217_vm2, %v2721_v56 }
  0x1b   :  { %3244 = vmatpush3.bf16.msra.mxu1 %v3649_v9  ;;  %2977 = vmatprep.mubr.msk.f32.mxu1 %vm3549_vm1, %v3550_v17 }
  0x1c   :  { %3245 = vmatprep.subr.bf16.mxu1 %v3548_v14 }
  0x1f   :  { %3247 = vmatpush3.bf16.msra.mxu1 %v3671_v16 }
  0x20   :  { %3254 = vmatprep.subr.bf16.mxu1 %v3548_v14 }
  0xdd   :  { %v3687_v19 = vpop.f32.mrb[0].mxu1 }
  0xde   :  { %v3689_v20 = vpop.f32.mrb[1].mxu1 }
  0xdf   :  { %v3691_v21 = vpop.f32.mrb[0].mxu0 }
  0xe0   :  { %v150_v22 = vpop.f32.mrb[1].mxu0  ;;  %v156_v1 = vadd.f32 %v3691_v21, %v3696_v23 }
  0xe1   :  { %v3698_v24 = vpop.f32.mrb[2].mxu1  ;;  %v151_v26 = vadd.f32 %v3696_v23, %v150_v22 }
  0xe2   :  { %v3700_v25 = vpop.f32.mrb[3].mxu1 }
  0xe3   :  { %v3774_v60 = vpop.f32.mrb[2].mxu0 }
  0xe4   :  { %v3776_v61 = vpop.f32.mrb[3].mxu0 }
  0xe5   :  { %v287_v27 = vpop.f32.mrb[4].mxu1 }
  0xe6   :  { %v291_v28 = vadd.f32 %v287_v27, %v151_v26  ;;  %v2946_v29 = vpop.f32.mrb[5].mxu1 }
  0xe8   :  { %3386 = vtanh.f32 %v291_v28  ;;  %v2724_v32 = vmul.f32 -1.442695, %v291_v28 }
  0xea   :  { %3388 = vpow2.f32 %v2724_v32 }
  0xed   :  { %v389_v62 = vpop.f32.mrb[6].mxu1 }
  0xee   :  { %v2957_v63 = vpop.f32.mrb[7].mxu1 }
  0xf2   :  { %v3387_v30 = vpop.eup %3386 }
  0xf3   :  { %305 = vrot.lane.b32.xlu0 %v3387_v30, %s3551_s19 }
  0xf4   :  { %v3389_v33 = vpop.eup %3388 }
  0xf5   :  { %v295_v34 = vadd.f32 1.0, %v3389_v33 }
  0xf7   :  { %300 = vrot.lane.b32.xlu0 %v211_v31, %s3552_s3  ;;  %3390 = vrcp.f32 %v295_v34 }
 0x101   :  { %v3391_v35 = vpop.eup %3390 }
 0x165   :  { %v306_v36 = vpop.permute.xlu0 %305 }
 0x166   :  { %v308_v37 = vmul.f32 %v3391_v35, %v306_v36 }
 0x168   :  { %310 = vrot.lane.b32.xlu1 %v308_v37, %s3552_s3 }
 0x169   :  { %v301_v38 = vpop.permute.xlu0 %300 }
 0x16a   :  { %v303_v39 = vmul.f32 %v3391_v35, %v301_v38 }
 0x1da   :  { %v311_v40 = vpop.permute.xlu1 %310 }
 0x1db   :  { %v3709_v41 = vadd.f32 %v311_v40, %v303_v39 }
 0x1dd   :  { %3392 = vtanh.f32 %v3709_v41 }
 0x1e7   :  { %v3393_v57 = vpop.eup %3392 }
 0x1e8   :  { %316 = vrot.lane.b32.xlu1 %v3393_v57, %s3551_s19 }
 0x25a   :  { %v317_v58 = vpop.permute.xlu1 %316 }
 0x25b   :  { %v319_v59 = vmul.f32 %v3391_v35, %v317_v58 }
 0x25d   :  { %394 = vrot.lane.b32.xlu0 %v319_v59, %s3552_s3  ;;  %v161_v59 = vadd.f32 %v3696_v23, %v3776_v61 }
 0x2cf   :  { %v395_v0 = vpop.permute.xlu0 %394 }
 0x2d0   :  { %2967 = vmatmul.mubr.msk.f32.vlgmr.msra.gmra.mrb[4].mxu0 %vm217_vm2, %v395_v0  ;;  %2978 = vmatmul.mubr.msk.f32.vlgmr.msra.gmra.mrb[8].mxu1 %vm217_vm2, %v395_v0 }
 0x2d1   :  { %3256 = vmatpush3.bf16.msra.mxu1 %v3740_v51  ;;  %3250 = vmatpush3.bf16.msra.mxu0 %v3728_v47 }
 0x2d2   :  { %3257 = vmatprep.subr.bf16.mxu1 %v3548_v14  ;;  %3251 = vmatprep.subr.bf16.mxu0 %v3548_v14 }
 0x2d3   :  { %2999 = vmatprep.mubr.msk.f32.mxu1 %vm3549_vm1, %v3550_v17  ;;  %2988 = vmatprep.mubr.msk.f32.mxu0 %vm3549_vm1, %v3550_v17 }
 0x2d5   :  { %3259 = vmatpush3.bf16.msra.mxu1 %v3755_v55  ;;  %3253 = vmatpush3.bf16.msra.mxu0 %v3751_v54 }
 0x2d6   :  { %3260 = vmatprep.subr.bf16.mxu0 %v3548_v14  ;;  %3266 = vmatprep.subr.bf16.mxu1 %v3548_v14 }
 0x3a3   :  { %v464_v3 = vpop.f32.mrb[4].mxu0  ;;  %v576_v4 = vpop.f32.mrb[8].mxu1 }
 0x3a4   :  { %v465_v5 = vadd.f32 %v464_v3, %v389_v62  ;;  %v580_v6 = vadd.f32 %v576_v4, %v156_v1  ;;  %v2968_v7 = vpop.f32.mrb[5].mxu0  ;;  %v2979_v8 = vpop.f32.mrb[9].mxu1 }
 0x3a6   :  { %v474_v10 = vadd.f32 %v3797_v2, %v465_v5  ;;  %3394 = vtanh.f32 %v580_v6  ;;  %v2730_v15 = vmul.f32 -1.442695, %v580_v6 }
 0x3a8   :  { %3396 = vtanh.f32 %v474_v10  ;;  %v2728_v18 = vmul.f32 -1.442695, %v474_v10 }
 0x3a9   :  { %3398 = vpow2.f32 %v2730_v15 }
 0x3aa   :  { %3400 = vpow2.f32 %v2728_v18 }
 0x3b0   :  { %v3395_v11 = vpop.eup %3394 }
 0x3b1   :  { %590 = vrot.lane.b32.xlu0 %v3395_v11, %s3551_s19 }
 0x3b2   :  { %v3397_v12 = vpop.eup %3396 }
 0x3b3   :  { %488 = vrot.lane.b32.xlu1 %v3397_v12, %s3551_s19  ;;  %v3399_v21 = vpop.eup %3398 }
 0x3b4   :  { %v3401_v22 = vpop.eup %3400  ;;  %v584_v26 = vadd.f32 1.0, %v3399_v21 }
 0x3b5   :  { %v478_v27 = vadd.f32 1.0, %v3401_v22 }
 0x3b6   :  { %3402 = vrcp.f32 %v584_v26 }
 0x3b7   :  { %483 = vrot.lane.b32.xlu1 %v2722_v13, %s3552_s3  ;;  %3404 = vrcp.f32 %v478_v27 }
 0x3c0   :  { %v3403_v28 = vpop.eup %3402 }
 0x3c1   :  { %v3405_v31 = vpop.eup %3404  ;;  %v588_v35 = vmul.f32 %v3403_v28, %v3709_v41 }
 0x423   :  { %v591_v29 = vpop.permute.xlu0 %590 }
 0x424   :  { %v593_v30 = vmul.f32 %v3403_v28, %v591_v29 }
 0x425   :  { %v489_v32 = vpop.permute.xlu1 %488 }
 0x426   :  { %v491_v33 = vmul.f32 %v3405_v31, %v489_v32  ;;  %595 = vrot.lane.b32.xlu1 %v593_v30, %s3552_s3 }
 0x428   :  { %493 = vrot.lane.b32.xlu0 %v491_v33, %s3552_s3 }
 0x429   :  { %v484_v34 = vpop.permute.xlu1 %483 }
 0x42a   :  { %v486_v37 = vmul.f32 %v3405_v31, %v484_v34 }
 0x498   :  { %v596_v36 = vpop.permute.xlu1 %595 }
 0x499   :  { %v3809_v38 = vadd.f32 %v596_v36, %v588_v35 }
 0x49a   :  { %v494_v39 = vpop.permute.xlu0 %493 }
 0x49b   :  { %3406 = vtanh.f32 %v3809_v38  ;;  %v3812_v40 = vadd.f32 %v494_v39, %v486_v37 }
 0x49d   :  { %3408 = vtanh.f32 %v3812_v40 }
 0x4a5   :  { %v3407_v42 = vpop.eup %3406 }
 0x4a6   :  { %601 = vrot.lane.b32.xlu1 %v3407_v42, %s3551_s19  ;;  %v166_v42 = vadd.f32 %v3774_v60, %v3696_v23 }
 0x4a7   :  { %v3409_v43 = vpop.eup %3408 }
 0x4a8   :  { %499 = vrot.lane.b32.xlu0 %v3409_v43, %s3551_s19 }
 0x518   :  { %v602_v44 = vpop.permute.xlu1 %601 }
 0x519   :  { %v604_v45 = vmul.f32 %v3403_v28, %v602_v44 }
 0x51a   :  { %v500_v41 = vpop.permute.xlu0 %499 }
 0x51b   :  { %v502_v46 = vmul.f32 %v3405_v31, %v500_v41  ;;  %678 = vrot.lane.b32.xlu1 %v604_v45, %s3552_s3 }
 0x51d   :  { %504 = vrot.lane.b32.xlu0 %v502_v46, %s3552_s3 }
 0x58d   :  { %v679_v48 = vpop.permute.xlu1 %678 }
 0x58e   :  { %3000 = vmatmul.mubr.msk.f32.vlgmr.msra.gmra.mrb[10].mxu1 %vm217_vm2, %v679_v48 }
 0x58f   :  { %v505_v49 = vpop.permute.xlu0 %504  ;;  %3268 = vmatpush3.bf16.msra.mxu1 %v3728_v47  ;;  %3021 = vmatprep.mubr.msk.f32.mxu1 %vm3549_vm1, %v3550_v17 }
 0x590   :  { %507 = vst.msk [vmem:[#allocation3] sm:$0xff] %vm217_vm2, %v505_v49  ;;  %2989 = vmatmul.mubr.msk.f32.vlgmr.msra.gmra.mrb[6].mxu0 %vm217_vm2, %v505_v49  ;;  %3269 = vmatprep.subr.bf16.mxu1 %v3548_v14 }
 0x591   :  { %3262 = vmatpush3.bf16.msra.mxu0 %v3649_v9  ;;  %3010 = vmatprep.mubr.msk.f32.mxu0 %vm3549_vm1, %v3550_v17 }
 0x592   :  { %3263 = vmatprep.subr.bf16.mxu0 %v3548_v14 }
 0x593   :  { %3271 = vmatpush3.bf16.msra.mxu1 %v3751_v54 }
 0x594   :  { %3278 = vmatprep.subr.bf16.mxu1 %v3548_v14 }
 0x595   :  { %3265 = vmatpush3.bf16.msra.mxu0 %v3671_v16 }
 0x596   :  { %3272 = vmatprep.subr.bf16.mxu0 %v3548_v14 }
 0x598   :  { %3011 = vmatmul.mubr.msk.f32.vlgmr.msra.gmra.mrb[8].mxu0 %vm217_vm2, %v679_v48 }
 0x599   :  { %3274 = vmatpush3.bf16.msra.mxu0 %v3740_v51  ;;  %3032 = vmatprep.mubr.msk.f32.mxu0 %vm3549_vm1, %v3550_v17 }
 0x59a   :  { %3275 = vmatprep.subr.bf16.mxu0 %v3548_v14 }
 0x59d   :  { %3277 = vmatpush3.bf16.msra.mxu0 %v3755_v55 }
 0x59e   :  { %3284 = vmatprep.subr.bf16.mxu0 %v3548_v14 }
 0x661   :  { %v748_v50 = vpop.f32.mrb[10].mxu1 }
 0x662   :  { %v3001_v52 = vpop.f32.mrb[11].mxu1 }
 0x663   :  { %v673_v53 = vpop.f32.mrb[6].mxu0 }
 0x664   :  { %v749_v56 = vadd.f32 %v748_v50, %v673_v53  ;;  %v2990_v57 = vpop.f32.mrb[7].mxu0 }
 0x666   :  { %v752_v58 = vadd.f32 %v3797_v2, %v749_v56 }
 0x668   :  { %3410 = vtanh.f32 %v752_v58  ;;  %v2733_v4 = vmul.f32 -1.442695, %v752_v58 }
 0x66b   :  { %v851_v62 = vpop.f32.mrb[8].mxu0 }
 0x66c   :  { %v855_v63 = vadd.f32 %v851_v62, %v161_v59  ;;  %v3012_v0 = vpop.f32.mrb[9].mxu0 }
 0x66e   :  { %3412 = vtanh.f32 %v855_v63  ;;  %v2735_v5 = vmul.f32 -1.442695, %v855_v63 }
 0x66f   :  { %3414 = vpow2.f32 %v2733_v4 }
 0x670   :  { %3416 = vpow2.f32 %v2735_v5 }
 0x672   :  { %v3411_v1 = vpop.eup %3410 }
 0x673   :  { %762 = vrot.lane.b32.xlu0 %v3411_v1, %s3551_s19 }
 0x678   :  { %v3413_v3 = vpop.eup %3412 }
 0x679   :  { %865 = vrot.lane.b32.xlu1 %v3413_v3, %s3551_s19  ;;  %v3415_v6 = vpop.eup %3414 }
 0x67a   :  { %v756_v7 = vadd.f32 1.0, %v3415_v6  ;;  %v3417_v8 = vpop.eup %3416 }
 0x67b   :  { %v859_v10 = vadd.f32 1.0, %v3417_v8 }
 0x67c   :  { %3418 = vrcp.f32 %v756_v7 }
 0x67d   :  { %3420 = vrcp.f32 %v859_v10 }
 0x686   :  { %v3419_v61 = vpop.eup %3418 }
 0x687   :  { %v3421_v13 = vpop.eup %3420  ;;  %v760_v21 = vmul.f32 %v3419_v61, %v3812_v40 }
 0x688   :  { %v863_v27 = vmul.f32 %v3421_v13, %v3809_v38 }
 0x6e5   :  { %v763_v11 = vpop.permute.xlu0 %762 }
 0x6e6   :  { %v765_v12 = vmul.f32 %v3419_v61, %v763_v11 }
 0x6e8   :  { %767 = vrot.lane.b32.xlu0 %v765_v12, %s3552_s3 }
 0x6eb   :  { %v866_v15 = vpop.permute.xlu1 %865 }
 0x6ec   :  { %v868_v18 = vmul.f32 %v3421_v13, %v866_v15 }
 0x6ee   :  { %870 = vrot.lane.b32.xlu1 %v868_v18, %s3552_s3 }
 0x75a   :  { %v768_v22 = vpop.permute.xlu0 %767 }
 0x75b   :  { %v3849_v26 = vadd.f32 %v768_v22, %v760_v21 }
 0x75d   :  { %3422 = vtanh.f32 %v3849_v26 }
 0x760   :  { %v871_v28 = vpop.permute.xlu1 %870 }
 0x761   :  { %v3853_v29 = vadd.f32 %v871_v28, %v863_v27 }
 0x763   :  { %3424 = vtanh.f32 %v3853_v29 }
 0x767   :  { %v3423_v30 = vpop.eup %3422 }
 0x768   :  { %773 = vrot.lane.b32.xlu0 %v3423_v30, %s3551_s19 }
 0x76d   :  { %v3425_v31 = vpop.eup %3424 }
 0x76e   :  { %876 = vrot.lane.b32.xlu1 %v3425_v31, %s3551_s19 }
 0x7da   :  { %v774_v32 = vpop.permute.xlu0 %773 }
 0x7db   :  { %v776_v33 = vmul.f32 %v3419_v61, %v774_v32  ;;  %v171_v32 = vadd.f32 %v3696_v23, %v3689_v20 }
 0x7dd   :  { %778 = vrot.lane.b32.xlu0 %v776_v33, %s3552_s3 }
 0x7e0   :  { %v877_v34 = vpop.permute.xlu1 %876 }
 0x7e1   :  { %v879_v35 = vmul.f32 %v3421_v13, %v877_v34 }
 0x7e3   :  { %953 = vrot.lane.b32.xlu1 %v879_v35, %s3552_s3 }
 0x84f   :  { %v779_v36 = vpop.permute.xlu0 %778 }
 0x850   :  { %782 = vst.msk [vmem:[#allocation3 + $0x8] sm:$0xff] %vm217_vm2, %v779_v36  ;;  %3022 = vmatmul.mubr.msk.f32.vlgmr.msra.gmra.mrb[12].mxu1 %vm217_vm2, %v779_v36 }
 0x851   :  { %3280 = vmatpush3.bf16.msra.mxu1 %v3649_v9  ;;  %3043 = vmatprep.mubr.msk.f32.mxu1 %vm3549_vm1, %v3550_v17 }
 0x852   :  { %3281 = vmatprep.subr.bf16.mxu1 %v3548_v14 }
 0x855   :  { %3283 = vmatpush3.bf16.msra.mxu1 %v3671_v16  ;;  %v954_v37 = vpop.permute.xlu1 %953 }
 0x856   :  { %3033 = vmatmul.mubr.msk.f32.vlgmr.msra.gmra.mrb[10].mxu0 %vm217_vm2, %v954_v37  ;;  %3290 = vmatprep.subr.bf16.mxu1 %v3548_v14 }
 0x857   :  { %3286 = vmatpush3.bf16.msra.mxu0 %v3728_v47  ;;  %3054 = vmatprep.mubr.msk.f32.mxu0 %vm3549_vm1, %v3550_v17 }
 0x858   :  { %3044 = vmatmul.mubr.msk.f32.vlgmr.msra.gmra.mrb[14].mxu1 %vm217_vm2, %v954_v37  ;;  %3287 = vmatprep.subr.bf16.mxu0 %v3548_v14 }
 0x859   :  { %3292 = vmatpush3.bf16.msra.mxu1 %v3740_v51  ;;  %3065 = vmatprep.mubr.msk.f32.mxu1 %vm3549_vm1, %v3550_v17 }
 0x85a   :  { %3293 = vmatprep.subr.bf16.mxu1 %v3548_v14 }
 0x85b   :  { %3289 = vmatpush3.bf16.msra.mxu0 %v3751_v54 }
 0x85c   :  { %3296 = vmatprep.subr.bf16.mxu0 %v3548_v14 }
 0x85d   :  { %3295 = vmatpush3.bf16.msra.mxu1 %v3755_v55 }
 0x85e   :  { %3302 = vmatprep.subr.bf16.mxu1 %v3548_v14 }
 0x923   :  { %v948_v38 = vpop.f32.mrb[12].mxu1 }
 0x924   :  { %v3023_v39 = vpop.f32.mrb[13].mxu1 }
 0x929   :  { %v1023_v40 = vpop.f32.mrb[10].mxu0 }
 0x92a   :  { %v1024_v43 = vadd.f32 %v1023_v40, %v948_v38  ;;  %v3034_v44 = vpop.f32.mrb[11].mxu0 }
 0x92b   :  { %v1126_v45 = vpop.f32.mrb[14].mxu1 }
 0x92c   :  { %v1027_v41 = vadd.f32 %v3797_v2, %v1024_v43  ;;  %v1130_v46 = vadd.f32 %v1126_v45, %v166_v42  ;;  %v3045_v48 = vpop.f32.mrb[15].mxu1 }
 0x92e   :  { %3426 = vtanh.f32 %v1027_v41  ;;  %v2738_v52 = vmul.f32 -1.442695, %v1027_v41  ;;  %v2740_v53 = vmul.f32 -1.442695, %v1130_v46 }
 0x92f   :  { %3428 = vtanh.f32 %v1130_v46 }
 0x930   :  { %3430 = vpow2.f32 %v2738_v52 }
 0x931   :  { %3432 = vpow2.f32 %v2740_v53 }
 0x938   :  { %v3427_v49 = vpop.eup %3426 }
 0x939   :  { %v3429_v50 = vpop.eup %3428  ;;  %1037 = vrot.lane.b32.xlu0 %v3427_v49, %s3551_s19 }
 0x93a   :  { %1140 = vrot.lane.b32.xlu1 %v3429_v50, %s3551_s19  ;;  %v3431_v60 = vpop.eup %3430 }
 0x93b   :  { %v3433_v56 = vpop.eup %3432  ;;  %v1031_v57 = vadd.f32 1.0, %v3431_v60 }
 0x93c   :  { %v1134_v58 = vadd.f32 1.0, %v3433_v56 }
 0x93d   :  { %3434 = vrcp.f32 %v1031_v57 }
 0x93e   :  { %3436 = vrcp.f32 %v1134_v58 }
 0x947   :  { %v3435_v59 = vpop.eup %3434 }
 0x948   :  { %v3437_v63 = vpop.eup %3436  ;;  %v1035_v4 = vmul.f32 %v3435_v59, %v3849_v26 }
 0x949   :  { %v1138_v5 = vmul.f32 %v3437_v63, %v3853_v29 }
 0x9ab   :  { %v1038_v62 = vpop.permute.xlu0 %1037 }
 0x9ac   :  { %v1141_v0 = vpop.permute.xlu1 %1140  ;;  %v1040_v1 = vmul.f32 %v3435_v59, %v1038_v62 }
 0x9ad   :  { %v1143_v3 = vmul.f32 %v3437_v63, %v1141_v0 }
 0x9ae   :  { %1042 = vrot.lane.b32.xlu0 %v1040_v1, %s3552_s3 }
 0x9af   :  { %1145 = vrot.lane.b32.xlu1 %v1143_v3, %s3552_s3 }
 0xa20   :  { %v1043_v6 = vpop.permute.xlu0 %1042 }
 0xa21   :  { %v1146_v7 = vpop.permute.xlu1 %1145  ;;  %v3891_v8 = vadd.f32 %v1043_v6, %v1035_v4 }
 0xa22   :  { %v3893_v10 = vadd.f32 %v1146_v7, %v1138_v5 }
 0xa23   :  { %3438 = vtanh.f32 %v3891_v8 }
 0xa24   :  { %3440 = vtanh.f32 %v3893_v10 }
 0xa2d   :  { %v3439_v61 = vpop.eup %3438 }
 0xa2e   :  { %v3441_v11 = vpop.eup %3440  ;;  %1048 = vrot.lane.b32.xlu0 %v3439_v61, %s3551_s19  ;;  %v176_v61 = vadd.f32 %v3687_v19, %v3696_v23 }
 0xa2f   :  { %1151 = vrot.lane.b32.xlu1 %v3441_v11, %s3551_s19 }
 0xaa0   :  { %v1049_v12 = vpop.permute.xlu0 %1048 }
 0xaa1   :  { %v1152_v13 = vpop.permute.xlu1 %1151  ;;  %v1051_v15 = vmul.f32 %v3435_v59, %v1049_v12 }
 0xaa2   :  { %v1154_v18 = vmul.f32 %v3437_v63, %v1152_v13 }
 0xaa3   :  { %1053 = vrot.lane.b32.xlu0 %v1051_v15, %s3552_s3 }
 0xaa4   :  { %1228 = vrot.lane.b32.xlu1 %v1154_v18, %s3552_s3 }
 0xb15   :  { %v1054_v21 = vpop.permute.xlu0 %1053 }
 0xb16   :  { %v1229_v22 = vpop.permute.xlu1 %1228  ;;  %1057 = vst.msk [vmem:[#allocation3 + $0x10] sm:$0xff] %vm217_vm2, %v1054_v21  ;;  %3055 = vmatmul.mubr.msk.f32.vlgmr.msra.gmra.mrb[12].mxu0 %vm217_vm2, %v1054_v21 }
 0xb17   :  { %3066 = vmatmul.mubr.msk.f32.vlgmr.msra.gmra.mrb[16].mxu1 %vm217_vm2, %v1229_v22  ;;  %3298 = vmatpush3.bf16.msra.mxu0 %v3649_v9 }
 0xb18   :  { %3299 = vmatprep.subr.bf16.mxu0 %v3548_v14  ;;  %3076 = vmatprep.mubr.msk.f32.mxu0 %vm3549_vm1, %v3550_v17 }
 0xb19   :  { %3304 = vmatpush3.bf16.msra.mxu1 %v3728_v47  ;;  %3087 = vmatprep.mubr.msk.f32.mxu1 %vm3549_vm1, %v3550_v17 }
 0xb1a   :  { %3305 = vmatprep.subr.bf16.mxu1 %v3548_v14 }
 0xb1b   :  { %3301 = vmatpush3.bf16.msra.mxu0 %v3671_v16 }
 0xb1c   :  { %3308 = vmatprep.subr.bf16.mxu0 %v3548_v14 }
 0xb1d   :  { %3307 = vmatpush3.bf16.msra.mxu1 %v3751_v54 }
 0xb1e   :  { %3077 = vmatmul.mubr.msk.f32.vlgmr.msra.gmra.mrb[14].mxu0 %vm217_vm2, %v1229_v22  ;;  %3314 = vmatprep.subr.bf16.mxu1 %v3548_v14 }
 0xb1f   :  { %3310 = vmatpush3.bf16.msra.mxu0 %v3740_v51  ;;  %3098 = vmatprep.mubr.msk.f32.mxu0 %vm3549_vm1, %v3550_v17 }
 0xb20   :  { %3311 = vmatprep.subr.bf16.mxu0 %v3548_v14 }
 0xb23   :  { %3313 = vmatpush3.bf16.msra.mxu0 %v3755_v55 }
 0xb24   :  { %3320 = vmatprep.subr.bf16.mxu0 %v3548_v14 }
 0xbe9   :  { %v1223_v26 = vpop.f32.mrb[12].mxu0 }
 0xbea   :  { %v1298_v27 = vpop.f32.mrb[16].mxu1  ;;  %v3056_v28 = vpop.f32.mrb[13].mxu0 }
 0xbeb   :  { %v1299_v29 = vadd.f32 %v1298_v27, %v1223_v26  ;;  %v3067_v30 = vpop.f32.mrb[17].mxu1 }
 0xbed   :  { %v1302_v31 = vadd.f32 %v3797_v2, %v1299_v29 }
 0xbef   :  { %3442 = vtanh.f32 %v1302_v31  ;;  %v2743_v38 = vmul.f32 -1.442695, %v1302_v31 }
 0xbf1   :  { %v1401_v33 = vpop.f32.mrb[14].mxu0 }
 0xbf2   :  { %v1405_v34 = vadd.f32 %v1401_v33, %v171_v32  ;;  %v3078_v35 = vpop.f32.mrb[15].mxu0 }
 0xbf4   :  { %3444 = vtanh.f32 %v1405_v34  ;;  %v2745_v39 = vmul.f32 -1.442695, %v1405_v34 }
 0xbf5   :  { %3446 = vpow2.f32 %v2743_v38 }
 0xbf6   :  { %3448 = vpow2.f32 %v2745_v39 }
 0xbf9   :  { %v3443_v36 = vpop.eup %3442 }
 0xbfa   :  { %1312 = vrot.lane.b32.xlu0 %v3443_v36, %s3551_s19 }
 0xbfe   :  { %v3445_v37 = vpop.eup %3444 }
 0xbff   :  { %1415 = vrot.lane.b32.xlu1 %v3445_v37, %s3551_s19  ;;  %v3447_v40 = vpop.eup %3446 }
 0xc00   :  { %v1306_v42 = vadd.f32 1.0, %v3447_v40  ;;  %v3449_v43 = vpop.eup %3448 }
 0xc01   :  { %v1409_v44 = vadd.f32 1.0, %v3449_v43 }
 0xc02   :  { %3450 = vrcp.f32 %v1306_v42 }
 0xc03   :  { %3452 = vrcp.f32 %v1409_v44 }
 0xc0c   :  { %v3451_v20 = vpop.eup %3450 }
 0xc0d   :  { %v3453_v46 = vpop.eup %3452  ;;  %v1310_v50 = vmul.f32 %v3451_v20, %v3891_v8 }
 0xc0e   :  { %v1413_v60 = vmul.f32 %v3453_v46, %v3893_v10 }
 0xc6c   :  { %v1313_v45 = vpop.permute.xlu0 %1312 }
 0xc6d   :  { %v1315_v41 = vmul.f32 %v3451_v20, %v1313_v45 }
 0xc6f   :  { %1317 = vrot.lane.b32.xlu0 %v1315_v41, %s3552_s3 }
 0xc71   :  { %v1416_v48 = vpop.permute.xlu1 %1415 }
 0xc72   :  { %v1418_v49 = vmul.f32 %v3453_v46, %v1416_v48 }
 0xc74   :  { %1420 = vrot.lane.b32.xlu1 %v1418_v49, %s3552_s3 }
 0xce1   :  { %v1318_v52 = vpop.permute.xlu0 %1317 }
 0xce2   :  { %v3931_v53 = vadd.f32 %v1318_v52, %v1310_v50 }
 0xce4   :  { %3454 = vtanh.f32 %v3931_v53 }
 0xce6   :  { %v1421_v56 = vpop.permute.xlu1 %1420 }
 0xce7   :  { %v3935_v57 = vadd.f32 %v1421_v56, %v1413_v60 }
 0xce9   :  { %3456 = vtanh.f32 %v3935_v57 }
 0xcee   :  { %v3455_v58 = vpop.eup %3454 }
 0xcef   :  { %1323 = vrot.lane.b32.xlu0 %v3455_v58, %s3551_s19  ;;  %v181_v58 = vadd.f32 %v3696_v23, %v3700_v25 }
 0xcf3   :  { %v3457_v59 = vpop.eup %3456 }
 0xcf4   :  { %1426 = vrot.lane.b32.xlu1 %v3457_v59, %s3551_s19 }
 0xd61   :  { %v1324_v62 = vpop.permute.xlu0 %1323 }
 0xd62   :  { %v1326_v63 = vmul.f32 %v3451_v20, %v1324_v62 }
 0xd64   :  { %1328 = vrot.lane.b32.xlu0 %v1326_v63, %s3552_s3 }
 0xd66   :  { %v1427_v0 = vpop.permute.xlu1 %1426 }
 0xd67   :  { %v1429_v1 = vmul.f32 %v3453_v46, %v1427_v0 }
 0xd69   :  { %1503 = vrot.lane.b32.xlu1 %v1429_v1, %s3552_s3 }
 0xdd6   :  { %v1329_v3 = vpop.permute.xlu0 %1328 }
 0xdd7   :  { %1332 = vst.msk [vmem:[#allocation3 + $0x18] sm:$0xff] %vm217_vm2, %v1329_v3  ;;  %3088 = vmatmul.mubr.msk.f32.vlgmr.msra.gmra.mrb[18].mxu1 %vm217_vm2, %v1329_v3 }
 0xdd8   :  { %3316 = vmatpush3.bf16.msra.mxu1 %v3649_v9  ;;  %3109 = vmatprep.mubr.msk.f32.mxu1 %vm3549_vm1, %v3550_v17 }
 0xdd9   :  { %3317 = vmatprep.subr.bf16.mxu1 %v3548_v14 }
 0xddb   :  { %v1504_v4 = vpop.permute.xlu1 %1503 }
 0xddc   :  { %3319 = vmatpush3.bf16.msra.mxu1 %v3671_v16  ;;  %3099 = vmatmul.mubr.msk.f32.vlgmr.msra.gmra.mrb[16].mxu0 %vm217_vm2, %v1504_v4 }
 0xddd   :  { %3322 = vmatpush3.bf16.msra.mxu0 %v3728_v47  ;;  %3326 = vmatprep.subr.bf16.mxu1 %v3548_v14 }
 0xdde   :  { %3323 = vmatprep.subr.bf16.mxu0 %v3548_v14  ;;  %3120 = vmatprep.mubr.msk.f32.mxu0 %vm3549_vm1, %v3550_v17 }
 0xddf   :  { %3110 = vmatmul.mubr.msk.f32.vlgmr.msra.gmra.mrb[20].mxu1 %vm217_vm2, %v1504_v4 }
 0xde0   :  { %3328 = vmatpush3.bf16.msra.mxu1 %v3740_v51  ;;  %3131 = vmatprep.mubr.msk.f32.mxu1 %vm3549_vm1, %v3550_v17 }
 0xde1   :  { %3325 = vmatpush3.bf16.msra.mxu0 %v3751_v54  ;;  %3329 = vmatprep.subr.bf16.mxu1 %v3548_v14 }
 0xde2   :  { %3332 = vmatprep.subr.bf16.mxu0 %v3548_v14 }
 0xde4   :  { %3331 = vmatpush3.bf16.msra.mxu1 %v3755_v55 }
 0xde5   :  { %3338 = vmatprep.subr.bf16.mxu1 %v3548_v14 }
 0xeaa   :  { %v1498_v5 = vpop.f32.mrb[18].mxu1 }
 0xeab   :  { %v3089_v6 = vpop.f32.mrb[19].mxu1 }
 0xeaf   :  { %v1573_v7 = vpop.f32.mrb[16].mxu0 }
 0xeb0   :  { %v1574_v8 = vadd.f32 %v1573_v7, %v1498_v5  ;;  %v3100_v10 = vpop.f32.mrb[17].mxu0 }
 0xeb2   :  { %v1577_v11 = vadd.f32 %v3797_v2, %v1574_v8  ;;  %v1676_v12 = vpop.f32.mrb[20].mxu1 }
 0xeb3   :  { %v1680_v13 = vadd.f32 %v1676_v12, %v176_v61  ;;  %v3111_v15 = vpop.f32.mrb[21].mxu1 }
 0xeb4   :  { %3458 = vtanh.f32 %v1577_v11  ;;  %v2748_v22 = vmul.f32 -1.442695, %v1577_v11 }
 0xeb5   :  { %3460 = vtanh.f32 %v1680_v13  ;;  %v2750_v26 = vmul.f32 -1.442695, %v1680_v13 }
 0xeb6   :  { %3462 = vpow2.f32 %v2748_v22 }
 0xeb7   :  { %3464 = vpow2.f32 %v2750_v26 }
 0xebe   :  { %v3459_v18 = vpop.eup %3458 }
 0xebf   :  { %v3461_v21 = vpop.eup %3460  ;;  %1587 = vrot.lane.b32.xlu0 %v3459_v18, %s3551_s19 }
 0xec0   :  { %1690 = vrot.lane.b32.xlu1 %v3461_v21, %s3551_s19  ;;  %v3463_v27 = vpop.eup %3462 }
 0xec1   :  { %v3465_v28 = vpop.eup %3464  ;;  %v1581_v19 = vadd.f32 1.0, %v3463_v27 }
 0xec2   :  { %v1684_v29 = vadd.f32 1.0, %v3465_v28 }
 0xec3   :  { %3466 = vrcp.f32 %v1581_v19 }
 0xec4   :  { %3468 = vrcp.f32 %v1684_v29 }
 0xecd   :  { %v3467_v30 = vpop.eup %3466 }
 0xece   :  { %v3469_v32 = vpop.eup %3468  ;;  %v1585_v36 = vmul.f32 %v3467_v30, %v3931_v53 }
 0xecf   :  { %v1688_v37 = vmul.f32 %v3469_v32, %v3935_v57 }
 0xf31   :  { %v1588_v31 = vpop.permute.xlu0 %1587 }
 0xf32   :  { %v1691_v33 = vpop.permute.xlu1 %1690  ;;  %v1590_v34 = vmul.f32 %v3467_v30, %v1588_v31 }
 0xf33   :  { %v1693_v35 = vmul.f32 %v3469_v32, %v1691_v33 }
 0xf34   :  { %1592 = vrot.lane.b32.xlu0 %v1590_v34, %s3552_s3 }
 0xf35   :  { %1695 = vrot.lane.b32.xlu1 %v1693_v35, %s3552_s3 }
 0xfa6   :  { %v1593_v38 = vpop.permute.xlu0 %1592 }
 0xfa7   :  { %v1696_v39 = vpop.permute.xlu1 %1695  ;;  %v3973_v40 = vadd.f32 %v1593_v38, %v1585_v36  ;;  %v3546_v36 = vld [vmem:[%s4205_s5] ss:$0 sm:$0xff] }
 0xfa8   :  { %v3975_v42 = vadd.f32 %v1696_v39, %v1688_v37 }
 0xfa9   :  { %3470 = vtanh.f32 %v3973_v40 }
 0xfaa   :  { %3472 = vtanh.f32 %v3975_v42 }
 0xfb3   :  { %v3471_v43 = vpop.eup %3470 }
 0xfb4   :  { %v3473_v44 = vpop.eup %3472  ;;  %1598 = vrot.lane.b32.xlu0 %v3471_v43, %s3551_s19 }
 0xfb5   :  { %1701 = vrot.lane.b32.xlu1 %v3473_v44, %s3551_s19 }
0x1026   :  { %v1599_v20 = vpop.permute.xlu0 %1598 }
0x1027   :  { %v1702_v45 = vpop.permute.xlu1 %1701  ;;  %v1601_v41 = vmul.f32 %v3467_v30, %v1599_v20 }
0x1028   :  { %v1704_v46 = vmul.f32 %v3469_v32, %v1702_v45 }
0x1029   :  { %1603 = vrot.lane.b32.xlu0 %v1601_v41, %s3552_s3 }
0x102a   :  { %1778 = vrot.lane.b32.xlu1 %v1704_v46, %s3552_s3 }
0x109b   :  { %v1604_v48 = vpop.permute.xlu0 %1603 }
0x109c   :  { %v1779_v49 = vpop.permute.xlu1 %1778  ;;  %1607 = vst.msk [vmem:[#allocation3 + $0x20] sm:$0xff] %vm217_vm2, %v1604_v48  ;;  %3121 = vmatmul.mubr.msk.f32.vlgmr.msra.gmra.mrb[18].mxu0 %vm217_vm2, %v1604_v48 }
0x109d   :  { %3132 = vmatmul.mubr.msk.f32.vlgmr.msra.gmra.mrb[22].mxu1 %vm217_vm2, %v1779_v49  ;;  %3334 = vmatpush3.bf16.msra.mxu0 %v3649_v9 }
0x109e   :  { %3335 = vmatprep.subr.bf16.mxu0 %v3548_v14  ;;  %3142 = vmatprep.mubr.msk.f32.mxu0 %vm3549_vm1, %v3550_v17 }
0x109f   :  { %3340 = vmatpush3.bf16.msra.mxu1 %v3728_v47  ;;  %3153 = vmatprep.mubr.msk.f32.mxu1 %vm3549_vm1, %v3550_v17 }
0x10a0   :  { %3341 = vmatprep.subr.bf16.mxu1 %v3548_v14 }
0x10a1   :  { %3337 = vmatpush3.bf16.msra.mxu0 %v3671_v16 }
0x10a2   :  { %3344 = vmatprep.subr.bf16.mxu0 %v3548_v14 }
0x10a3   :  { %3343 = vmatpush3.bf16.msra.mxu1 %v3751_v54 }
0x10a4   :  { %3143 = vmatmul.mubr.msk.f32.vlgmr.msra.gmra.mrb[20].mxu0 %vm217_vm2, %v1779_v49  ;;  %3350 = vmatprep.subr.bf16.mxu1 %v3548_v14 }
0x10a5   :  { %3346 = vmatpush3.bf16.msra.mxu0 %v3740_v51  ;;  %3164 = vmatprep.mubr.msk.f32.mxu0 %vm3549_vm1, %v3550_v17 }
0x10a6   :  { %3347 = vmatprep.subr.bf16.mxu0 %v3548_v14 }
0x10a9   :  { %3349 = vmatpush3.bf16.msra.mxu0 %v3755_v55 }
0x10aa   :  { %3356 = vmatprep.subr.bf16.mxu0 %v3548_v14 }
0x116f   :  { %v1773_v50 = vpop.f32.mrb[18].mxu0 }
0x1170   :  { %v1848_v52 = vpop.f32.mrb[22].mxu1  ;;  %v3122_v53 = vpop.f32.mrb[19].mxu0 }
0x1171   :  { %v1849_v60 = vadd.f32 %v1848_v52, %v1773_v50  ;;  %v3133_v56 = vpop.f32.mrb[23].mxu1 }
0x1173   :  { %v1852_v57 = vadd.f32 %v3797_v2, %v1849_v60 }
0x1175   :  { %3474 = vtanh.f32 %v1852_v57  ;;  %v2753_v3 = vmul.f32 -1.442695, %v1852_v57 }
0x1177   :  { %v1951_v59 = vpop.f32.mrb[20].mxu0 }
0x1178   :  { %v1955_v62 = vadd.f32 %v1951_v59, %v181_v58  ;;  %v3144_v63 = vpop.f32.mrb[21].mxu0  ;;  %v2456_v59 = vld [vmem:[%s4210_s9] sm:$0xff] }
0x117a   :  { %3476 = vtanh.f32 %v1955_v62  ;;  %v2755_v4 = vmul.f32 -1.442695, %v1955_v62  ;;  %v2457_v62 = vld [vmem:[%s4210_s9 + $0x8] sm:$0xff] }
0x117b   :  { %3478 = vpow2.f32 %v2753_v3  ;;  %v3368_v63 = vpack.c.bf16 %v2457_v62, %v2456_v59 }
0x117c   :  { %3480 = vpow2.f32 %v2755_v4 }
0x117f   :  { %v3475_v0 = vpop.eup %3474 }
0x1180   :  { %1862 = vrot.lane.b32.xlu0 %v3475_v0, %s3551_s19 }
0x1184   :  { %v3477_v1 = vpop.eup %3476 }
0x1185   :  { %1965 = vrot.lane.b32.xlu1 %v3477_v1, %s3551_s19  ;;  %v3479_v5 = vpop.eup %3478 }
0x1186   :  { %v1856_v6 = vadd.f32 1.0, %v3479_v5  ;;  %v3481_v7 = vpop.eup %3480  ;;  %v2458_v5 = vld [vmem:[%s4210_s9 + $0x10] sm:$0xff] }
0x1187   :  { %v1959_v8 = vadd.f32 1.0, %v3481_v7 }
0x1188   :  { %3482 = vrcp.f32 %v1856_v6  ;;  %v2459_v6 = vld [vmem:[%s4210_s9 + $0x18] sm:$0xff] }
0x1189   :  { %3484 = vrcp.f32 %v1959_v8  ;;  %v3372_v7 = vpack.c.bf16 %v2459_v6, %v2458_v5 }
0x1192   :  { %v3483_v23 = vpop.eup %3482 }
0x1193   :  { %v3485_v61 = vpop.eup %3484  ;;  %v1860_v13 = vmul.f32 %v3483_v23, %v3973_v40 }
0x1194   :  { %v1963_v21 = vmul.f32 %v3485_v61, %v3975_v42 }
0x11f2   :  { %v1863_v25 = vpop.permute.xlu0 %1862 }
0x11f3   :  { %v1865_v10 = vmul.f32 %v3483_v23, %v1863_v25  ;;  %v2448_v25 = vld [vmem:[#allocation3] sm:$0xff] }
0x11f5   :  { %1867 = vrot.lane.b32.xlu0 %v1865_v10, %s3552_s3  ;;  %v2449_v10 = vld [vmem:[#allocation3 + $0x8] sm:$0xff] }
0x11f7   :  { %v1966_v11 = vpop.permute.xlu1 %1965 }
0x11f8   :  { %v1968_v12 = vmul.f32 %v3485_v61, %v1966_v11  ;;  %v2451_v11 = vld [vmem:[#allocation3 + $0x18] sm:$0xff] }
0x11fa   :  { %1970 = vrot.lane.b32.xlu1 %v1968_v12, %s3552_s3  ;;  %v2452_v12 = vld [vmem:[#allocation3 + $0x20] sm:$0xff] }
0x1267   :  { %v1868_v15 = vpop.permute.xlu0 %1867 }
0x1268   :  { %v4013_v18 = vadd.f32 %v1868_v15, %v1860_v13 }
0x126a   :  { %3486 = vtanh.f32 %v4013_v18 }
0x126c   :  { %v1971_v22 = vpop.permute.xlu1 %1970 }
0x126d   :  { %v4017_v26 = vadd.f32 %v1971_v22, %v1963_v21 }
0x126f   :  { %3488 = vtanh.f32 %v4017_v26 }
0x1274   :  { %v3487_v27 = vpop.eup %3486 }
0x1275   :  { %1873 = vrot.lane.b32.xlu0 %v3487_v27, %s3551_s19 }
0x1279   :  { %v3489_v28 = vpop.eup %3488 }
0x127a   :  { %1976 = vrot.lane.b32.xlu1 %v3489_v28, %s3551_s19  ;;  %v3547_v28 = vld [vmem:[%s4209_s8] ss:$0 sm:$0xff] }
0x12e7   :  { %v1874_v19 = vpop.permute.xlu0 %1873 }
0x12e8   :  { %v1876_v29 = vmul.f32 %v3483_v23, %v1874_v19 }
0x12ea   :  { %1878 = vrot.lane.b32.xlu0 %v1876_v29, %s3552_s3 }
0x12ec   :  { %v1977_v30 = vpop.permute.xlu1 %1976 }
0x12ed   :  { %v1979_v31 = vmul.f32 %v3485_v61, %v1977_v30  ;;  %v2450_v61 = vld [vmem:[#allocation3 + $0x10] sm:$0xff] }
0x12ef   :  { %2053 = vrot.lane.b32.xlu1 %v1979_v31, %s3552_s3 }
0x135c   :  { %v1879_v32 = vpop.permute.xlu0 %1878 }
0x135d   :  { %1882 = vst.msk [vmem:[#allocation3 + $0x28] sm:$0xff] %vm217_vm2, %v1879_v32  ;;  %3154 = vmatmul.mubr.msk.f32.vlgmr.msra.gmra.mrb[24].mxu1 %vm217_vm2, %v1879_v32 }
0x135e   :  { %3352 = vmatpush3.bf16.msra.mxu1 %v3649_v9  ;;  %3175 = vmatprep.mubr.msk.f32.mxu1 %vm3549_vm1, %v3550_v17 }
0x135f   :  { %3353 = vmatprep.subr.bf16.mxu1 %v3548_v14 }
0x1361   :  { %v2054_v33 = vpop.permute.xlu1 %2053 }
0x1362   :  { %3355 = vmatpush3.bf16.msra.mxu1 %v3671_v16  ;;  %3165 = vmatmul.mubr.msk.f32.vlgmr.msra.gmra.mrb[22].mxu0 %vm217_vm2, %v2054_v33 }
0x1363   :  { %3358 = vmatpush3.bf16.msra.mxu0 %v3728_v47  ;;  %3362 = vmatprep.subr.bf16.mxu1 %v3548_v14 }
0x1364   :  { %3359 = vmatprep.subr.bf16.mxu0 %v3548_v14  ;;  %3186 = vmatprep.mubr.msk.f32.mxu0 %vm3549_vm1, %v3550_v17  ;;  %v2453_v13 = vld [vmem:[#allocation3 + $0x28] sm:$0xff] }
0x1365   :  { %3176 = vmatmul.mubr.msk.f32.vlgmr.msra.gmra.mrb[26].mxu1 %vm217_vm2, %v2054_v33 }
0x1366   :  { %3364 = vmatpush3.bf16.msra.mxu1 %v3740_v51  ;;  %3197 = vmatprep.mubr.msk.f32.mxu1 %vm3549_vm1, %v3550_v17  ;;  %v186_v51 = vadd.f32 %v3546_v36, %v3698_v24 }
0x1367   :  { %3361 = vmatpush3.bf16.msra.mxu0 %v3751_v54  ;;  %3365 = vmatprep.subr.bf16.mxu1 %v3548_v14 }
0x1368   :  { %3369 = vmatprep.subr.bf16.mxu0 %v3368_v63 }
0x136a   :  { %3367 = vmatpush3.bf16.msra.mxu1 %v3755_v55 }
0x1430   :  { %v2048_v9 = vpop.f32.mrb[24].mxu1 }
0x1431   :  { %v3155_v16 = vpop.f32.mrb[25].mxu1 }
0x1435   :  { %v2123_v47 = vpop.f32.mrb[22].mxu0 }
0x1436   :  { %v2124_v34 = vadd.f32 %v2123_v47, %v2048_v9  ;;  %v3166_v35 = vpop.f32.mrb[23].mxu0 }
0x1438   :  { %v2127_v37 = vadd.f32 %v3797_v2, %v2124_v34  ;;  %v2226_v17 = vpop.f32.mrb[26].mxu1 }
0x1439   :  { %v2230_v38 = vadd.f32 %v2226_v17, %v186_v51  ;;  %v3177_v54 = vpop.f32.mrb[27].mxu1 }
0x143a   :  { %3490 = vtanh.f32 %v2127_v37  ;;  %v2758_v39 = vmul.f32 -1.442695, %v2127_v37 }
0x143b   :  { %3492 = vtanh.f32 %v2230_v38  ;;  %v2760_v40 = vmul.f32 -1.442695, %v2230_v38 }
0x143c   :  { %3494 = vpow2.f32 %v2758_v39 }
0x143d   :  { %3496 = vpow2.f32 %v2760_v40 }
0x1444   :  { %v3491_v14 = vpop.eup %3490 }
0x1445   :  { %v3493_v55 = vpop.eup %3492  ;;  %2137 = vrot.lane.b32.xlu0 %v3491_v14, %s3551_s19 }
0x1446   :  { %2240 = vrot.lane.b32.xlu1 %v3493_v55, %s3551_s19  ;;  %v3495_v42 = vpop.eup %3494  ;;  %v2766_v55 = vld [vmem:[%s4212_s10] ss:$0 sm:$0xff] }
0x1447   :  { %v3497_v43 = vpop.eup %3496  ;;  %v2131_v24 = vadd.f32 1.0, %v3495_v42 }
0x1448   :  { %v2234_v44 = vadd.f32 1.0, %v3497_v43 }
0x1449   :  { %3498 = vrcp.f32 %v2131_v24 }
0x144a   :  { %3500 = vrcp.f32 %v2234_v44 }
0x1453   :  { %v3499_v2 = vpop.eup %3498 }
0x1454   :  { %v3501_v45 = vpop.eup %3500  ;;  %v2135_v49 = vmul.f32 %v3499_v2, %v4013_v18 }
0x1455   :  { %v2238_v50 = vmul.f32 %v3501_v45, %v4017_v26 }
0x14b7   :  { %v2138_v20 = vpop.permute.xlu0 %2137 }
0x14b8   :  { %v2241_v41 = vpop.permute.xlu1 %2240  ;;  %v2140_v46 = vmul.f32 %v3499_v2, %v2138_v20 }
0x14b9   :  { %v2243_v48 = vmul.f32 %v3501_v45, %v2241_v41 }
0x14ba   :  { %2142 = vrot.lane.b32.xlu0 %v2140_v46, %s3552_s3 }
0x14bb   :  { %2245 = vrot.lane.b32.xlu1 %v2243_v48, %s3552_s3 }
0x152c   :  { %v2143_v52 = vpop.permute.xlu0 %2142 }
0x152d   :  { %v2246_v53 = vpop.permute.xlu1 %2245  ;;  %v4055_v60 = vadd.f32 %v2143_v52, %v2135_v49 }
0x152e   :  { %v4057_v56 = vadd.f32 %v2246_v53, %v2238_v50 }
0x152f   :  { %3502 = vtanh.f32 %v4055_v60 }
0x1530   :  { %3504 = vtanh.f32 %v4057_v56 }
0x1539   :  { %v3503_v57 = vpop.eup %3502 }
0x153a   :  { %v3505_v58 = vpop.eup %3504  ;;  %2148 = vrot.lane.b32.xlu0 %v3503_v57, %s3551_s19 }
0x153b   :  { %2251 = vrot.lane.b32.xlu1 %v3505_v58, %s3551_s19 }
0x15ac   :  { %v2149_v0 = vpop.permute.xlu0 %2148 }
0x15ad   :  { %v2252_v1 = vpop.permute.xlu1 %2251  ;;  %v2151_v3 = vmul.f32 %v3499_v2, %v2149_v0 }
0x15ae   :  { %v2254_v4 = vmul.f32 %v3501_v45, %v2252_v1 }
0x15af   :  { %2153 = vrot.lane.b32.xlu0 %v2151_v3, %s3552_s3 }
0x15b0   :  { %2328 = vrot.lane.b32.xlu1 %v2254_v4, %s3552_s3 }
0x1621   :  { %v2154_v8 = vpop.permute.xlu0 %2153 }
0x1622   :  { %v2329_v23 = vpop.permute.xlu1 %2328  ;;  %2157 = vst.msk [vmem:[#allocation3 + $0x30] sm:$0xff] %vm217_vm2, %v2154_v8  ;;  %3187 = vmatmul.mubr.msk.f32.vlgmr.msra.gmra.mrb[24].mxu0 %vm217_vm2, %v2154_v8 }
0x1623   :  { %2434 = vst.msk [vmem:[%s4211_s12] sm:$0xff] %vm217_vm2, %v2329_v23  ;;  %3198 = vmatmul.mubr.msk.f32.vlgmr.msra.gmra.mrb[28].mxu1 %vm217_vm2, %v2329_v23  ;;  %3371 = vmatpush3.bf16.msra.mxu0 %v3368_v63 }
0x1624   :  { %3208 = vmatprep.mubr.msk.f32.mxu0 %vm217_vm2, %v2448_v25  ;;  %3373 = vmatprep.subr.bf16.mxu0 %v3372_v7 }
0x1627   :  { %3375 = vmatpush3.bf16.msra.mxu0 %v3372_v7 }
0x1629   :  { %v2454_v15 = vld [vmem:[#allocation3 + $0x30] sm:$0xff] }
0x162a   :  { %3209 = vmatmul.mubr.msk.f32.vlgmr.msra.gmra.mrb[26].mxu0 %vm217_vm2, %v2449_v10 }
0x162b   :  { %3211 = vmatprep.mubr.msk.f32.mxu0 %vm217_vm2, %v2450_v61 }
0x162e   :  { %3212 = vmatmul.mubr.msk.f32.gmra.mrb[28].mxu0 %vm217_vm2, %v2451_v11 }
0x162f   :  { %3214 = vmatprep.mubr.msk.f32.mxu0 %vm217_vm2, %v2452_v12 }
0x1632   :  { %3215 = vmatmul.mubr.msk.f32.gmra.mrb[30].mxu0 %vm217_vm2, %v2453_v13 }
0x1633   :  { %3217 = vmatprep.mubr.msk.f32.mxu0 %vm217_vm2, %v2454_v15 }
0x16f5   :  { %v2323_v18 = vpop.f32.mrb[24].mxu0 }
0x16f6   :  { %v2398_v21 = vpop.f32.mrb[28].mxu1  ;;  %v3188_v22 = vpop.f32.mrb[25].mxu0 }
0x16f7   :  { %v2399_v26 = vadd.f32 %v2398_v21, %v2323_v18  ;;  %v3199_v27 = vpop.f32.mrb[29].mxu1 }
0x16f9   :  { %v2402_v19 = vadd.f32 %v3547_v28, %v2399_v26 }
0x16fb   :  { %3506 = vtanh.f32 %v2402_v19  ;;  %v2763_v47 = vmul.f32 -1.442695, %v2402_v19 }
0x16fd   :  { %v3210_v29 = vpop.f32.mrb[26].mxu0  ;;  %3508 = vpow2.f32 %v2763_v47 }
0x16fe   :  { %v2557_v30 = vpop.f32.mrb[27].mxu0  ;;  %v2563_v46 = vadd.f32 %v3210_v29, %v2766_v55 }
0x16ff   :  { %v2558_v39 = vadd.f32 %v2766_v55, %v2557_v30 }
0x1700   :  { %v2599_v49 = vsel %vm217_vm2, %v2563_v46, -inf }
0x1701   :  { %v3213_v31 = vpop.f32.mrb[28].mxu0  ;;  %v2596_v42 = vsel %vm217_vm2, %v2558_v39, -inf }
0x1702   :  { %v2567_v32 = vpop.f32.mrb[29].mxu0  ;;  %v2573_v43 = vadd.f32 %v3213_v31, %v2766_v55 }
0x1703   :  { %v2568_v40 = vadd.f32 %v2766_v55, %v2567_v32 }
0x1704   :  { %v2605_v2 = vsel %vm217_vm2, %v2573_v43, -inf }
0x1705   :  { %v3507_v33 = vpop.eup %3506  ;;  %v3216_v9 = vpop.f32.mrb[30].mxu0  ;;  %v2602_v24 = vsel %vm217_vm2, %v2568_v40, -inf }
0x1706   :  { %2412 = vrot.lane.b32.xlu0 %v3507_v33, %s3551_s19  ;;  %v2577_v16 = vpop.f32.mrb[31].mxu0  ;;  %v2583_v44 = vadd.f32 %v3216_v9, %v2766_v55 }
0x1707   :  { %v3509_v34 = vpop.eup %3508  ;;  %v2578_v48 = vadd.f32 %v2766_v55, %v2577_v16 }
0x1708   :  { %v2406_v35 = vadd.f32 1.0, %v3509_v34  ;;  %v2611_v20 = vsel %vm217_vm2, %v2583_v44, -inf }
0x1709   :  { %v2608_v50 = vsel %vm217_vm2, %v2578_v48, -inf }
0x170a   :  { %3510 = vrcp.f32 %v2406_v35 }
0x1714   :  { %v3511_v36 = vpop.eup %3510 }
0x1715   :  { %v2410_v17 = vmul.f32 %v3511_v36, %v4055_v60 }
0x1778   :  { %v2413_v51 = vpop.permute.xlu0 %2412 }
0x1779   :  { %v2415_v37 = vmul.f32 %v3511_v36, %v2413_v51 }
0x177b   :  { %2417 = vrot.lane.b32.xlu1 %v2415_v37, %s3552_s3 }
0x17ed   :  { %v2418_v38 = vpop.permute.xlu1 %2417 }
0x17ee   :  { %v4097_v54 = vadd.f32 %v2418_v38, %v2410_v17 }
0x17f0   :  { %3512 = vtanh.f32 %v4097_v54 }
0x17fa   :  { %v3513_v14 = vpop.eup %3512 }
0x17fb   :  { %2423 = vrot.lane.b32.xlu0 %v3513_v14, %s3551_s19 }
0x181a   :  { %2597 = vmax.xlane.f32.xlu0 %v2596_v42 }
0x181e   :  { %2603 = vmax.xlane.f32.xlu0 %v2602_v24 }
0x1822   :  { %2606 = vmax.xlane.f32.xlu0 %v2605_v2 }
0x1826   :  { %2612 = vmax.xlane.f32.xlu0 %v2611_v20 }
0x186d   :  { %v2424_v45 = vpop.permute.xlu0 %2423 }
0x186e   :  { %v2426_v41 = vmul.f32 %v3511_v36, %v2424_v45 }
0x1870   :  { %2428 = vrot.lane.b32.xlu1 %v2426_v41, %s3552_s3 }
0x1894   :  { %2600 = vmax.xlane.f32.xlu1 %v2599_v49 }
0x1898   :  { %2609 = vmax.xlane.f32.xlu1 %v2608_v50 }
0x18a7   :  { %v2598_v60 = vpop.xlane.xlu0 %2597 }
0x18a8   :  { %v4119_v63 = vsub.f32 %v2558_v39, %v2598_v60 }
0x18aa   :  { %v2628_v3 = vmul.f32 1.442695, %v4119_v63 }
0x18ab   :  { %v2604_v57 = vpop.xlane.xlu0 %2603 }
0x18ac   :  { %v4125_v4 = vsub.f32 %v2568_v40, %v2604_v57 }
0x18ae   :  { %v2632_v23 = vmul.f32 1.442695, %v4125_v4 }
0x18af   :  { %v2607_v59 = vpop.xlane.xlu0 %2606 }
0x18b0   :  { %v4121_v0 = vsub.f32 %v2573_v43, %v2607_v59 }
0x18b2   :  { %v2634_v7 = vmul.f32 1.442695, %v4121_v0 }
0x18b3   :  { %v2613_v5 = vpop.xlane.xlu0 %2612 }
0x18b4   :  { %v4128_v8 = vsub.f32 %v2583_v44, %v2613_v5 }
0x18b6   :  { %v2638_v10 = vmul.f32 1.442695, %v4128_v8 }
0x18e2   :  { %v2429_v52 = vpop.permute.xlu1 %2428 }
0x18e3   :  { %2432 = vst.msk [vmem:[#allocation3 + $0x38] sm:$0xff] %vm217_vm2, %v2429_v52  ;;  %2764 = vst.msk [vmem:[%s4211_s12 + $0x8] sm:$0xff] %vm217_vm2, %v2429_v52 }
0x18ea   :  { %v2455_v53 = vld [vmem:[#allocation3 + $0x38] sm:$0xff] }
0x18eb   :  { %3218 = vmatmul.mubr.msk.f32.gmra.mrb[32].mxu0 %vm217_vm2, %v2455_v53 }
0x1921   :  { %v2601_v58 = vpop.xlane.xlu1 %2600 }
0x1922   :  { %v4117_v62 = vsub.f32 %v2563_v46, %v2601_v58 }
0x1924   :  { %v2630_v1 = vmul.f32 1.442695, %v4117_v62 }
0x1925   :  { %v2610_v6 = vpop.xlane.xlu1 %2609 }
0x1926   :  { %3514 = vpow2.f32 %v2630_v1  ;;  %v4131_v25 = vsub.f32 %v2578_v48, %v2610_v6 }
0x1927   :  { %3516 = vpow2.f32 %v2628_v3 }
0x1928   :  { %3518 = vpow2.f32 %v2634_v7  ;;  %v2636_v61 = vmul.f32 1.442695, %v4131_v25 }
0x1929   :  { %3520 = vpow2.f32 %v2632_v23 }
0x192a   :  { %3522 = vpow2.f32 %v2638_v10 }
0x192b   :  { %3524 = vpow2.f32 %v2636_v61 }
0x1930   :  { %v3515_v21 = vpop.eup %3514 }
0x1931   :  { %v3517_v26 = vpop.eup %3516  ;;  %v2647_v27 = vsel %vm217_vm2, %v3515_v21, 0.0 }
0x1932   :  { %v3519_v28 = vpop.eup %3518  ;;  %v2644_v19 = vsel %vm217_vm2, %v3517_v26, 0.0 }
0x1933   :  { %v3521_v29 = vpop.eup %3520  ;;  %v2653_v30 = vsel %vm217_vm2, %v3519_v28, 0.0 }
0x1934   :  { %v3523_v31 = vpop.eup %3522  ;;  %v2650_v32 = vsel %vm217_vm2, %v3521_v29, 0.0 }
0x1935   :  { %v3525_v33 = vpop.eup %3524  ;;  %v2659_v9 = vsel %vm217_vm2, %v3523_v31, 0.0 }
0x1936   :  { %v2656_v16 = vsel %vm217_vm2, %v3525_v33, 0.0 }
0x19be   :  { %v3219_v11 = vpop.f32.mrb[32].mxu0 }
0x19bf   :  { %v2593_v12 = vadd.f32 %v3219_v11, %v2766_v55  ;;  %v2587_v13 = vpop.f32.mrb[33].mxu0 }
0x19c0   :  { %v2588_v15 = vadd.f32 %v2766_v55, %v2587_v13 }
0x19c1   :  { %v2617_v18 = vsel %vm217_vm2, %v2593_v12, -inf }
0x19c2   :  { %2618 = vmax.xlane.f32.xlu0 %v2617_v18  ;;  %v2614_v22 = vsel %vm217_vm2, %v2588_v15, -inf }
0x19c3   :  { %2615 = vmax.xlane.f32.xlu1 %v2614_v22 }
0x19c6   :  { %2648 = vadd.xlane.f32.xlu0 %v2647_v27 }
0x19c7   :  { %2645 = vadd.xlane.f32.xlu1 %v2644_v19 }
0x19ca   :  { %2654 = vadd.xlane.f32.xlu0 %v2653_v30 }
0x19cb   :  { %2651 = vadd.xlane.f32.xlu1 %v2650_v32 }
0x19ce   :  { %2660 = vadd.xlane.f32.xlu0 %v2659_v9 }
0x19cf   :  { %2657 = vadd.xlane.f32.xlu1 %v2656_v16 }
0x1a4f   :  { %v2619_v47 = vpop.xlane.xlu0 %2618 }
0x1a50   :  { %v4143_v34 = vsub.f32 %v2593_v12, %v2619_v47  ;;  %v2616_v35 = vpop.xlane.xlu1 %2615 }
0x1a51   :  { %v4145_v36 = vsub.f32 %v2588_v15, %v2616_v35 }
0x1a52   :  { %v2642_v51 = vmul.f32 1.442695, %v4143_v34 }
0x1a53   :  { %v2640_v37 = vmul.f32 1.442695, %v4145_v36  ;;  %v2649_v17 = vpop.xlane.xlu0 %2648 }
0x1a54   :  { %3526 = vpow2.f32 %v2642_v51  ;;  %v2646_v38 = vpop.xlane.xlu1 %2645 }
0x1a55   :  { %3528 = vpow2.f32 %v2640_v37 }
0x1a56   :  { %3530 = vlog2.f32 %v2649_v17 }
0x1a57   :  { %3532 = vlog2.f32 %v2646_v38  ;;  %v2655_v14 = vpop.xlane.xlu0 %2654 }
0x1a58   :  { %3534 = vlog2.f32 %v2655_v14  ;;  %v2652_v55 = vpop.xlane.xlu1 %2651 }
0x1a59   :  { %3536 = vlog2.f32 %v2652_v55 }
0x1a5b   :  { %v2661_v39 = vpop.xlane.xlu0 %2660 }
0x1a5c   :  { %3538 = vlog2.f32 %v2661_v39  ;;  %v2658_v40 = vpop.xlane.xlu1 %2657 }
0x1a5d   :  { %3540 = vlog2.f32 %v2658_v40 }
0x1a5e   :  { %v3527_v42 = vpop.eup %3526 }
0x1a5f   :  { %v3529_v43 = vpop.eup %3528  ;;  %v2665_v24 = vsel %vm217_vm2, %v3527_v42, 0.0 }
0x1a60   :  { %v3531_v44 = vpop.eup %3530  ;;  %2666 = vadd.xlane.f32.xlu0 %v2665_v24  ;;  %v2662_v2 = vsel %vm217_vm2, %v3529_v43, 0.0 }
0x1a61   :  { %v3533_v20 = vpop.eup %3532  ;;  %v2671_v45 = vmul.f32 0.6931472, %v3531_v44  ;;  %2663 = vadd.xlane.f32.xlu1 %v2662_v2 }
0x1a62   :  { %v3535_v41 = vpop.eup %3534  ;;  %v2669_v46 = vmul.f32 0.6931472, %v3533_v20 }
0x1a63   :  { %v3537_v48 = vpop.eup %3536  ;;  %v2685_v49 = vsub.f32 %v4117_v62, %v2671_v45  ;;  %v2675_v50 = vmul.f32 0.6931472, %v3535_v41 }
0x1a64   :  { %v2684_v52 = vsub.f32 %v4119_v63, %v2669_v46  ;;  %v2673_v53 = vmul.f32 0.6931472, %v3537_v48 }
0x1a65   :  { %2693 = vst.msk [vmem:[%s4213_s11 + $0x8] sm:$0xff] %vm217_vm2, %v2685_v49  ;;  %v2687_v60 = vsub.f32 %v4121_v0, %v2675_v50 }
0x1a66   :  { %v3539_v57 = vpop.eup %3538  ;;  %2692 = vst.msk [vmem:[%s4213_s11] sm:$0xff] %vm217_vm2, %v2684_v52  ;;  %v2686_v58 = vsub.f32 %v4125_v4, %v2673_v53 }
0x1a67   :  { %v3541_v59 = vpop.eup %3540  ;;  %2695 = vst.msk [vmem:[%s4213_s11 + $0x18] sm:$0xff] %vm217_vm2, %v2687_v60  ;;  %v2679_v62 = vmul.f32 0.6931472, %v3539_v57 }
0x1a68   :  { %2694 = vst.msk [vmem:[%s4213_s11 + $0x10] sm:$0xff] %vm217_vm2, %v2686_v58  ;;  %v2677_v63 = vmul.f32 0.6931472, %v3541_v59 }
0x1a69   :  { %v2689_v0 = vsub.f32 %v4128_v8, %v2679_v62 }
0x1a6a   :  { %v2688_v1 = vsub.f32 %v4131_v25, %v2677_v63 }
0x1a6b   :  { %2697 = vst.msk [vmem:[%s4213_s11 + $0x28] sm:$0xff] %vm217_vm2, %v2689_v0 }
0x1a6c   :  { %2696 = vst.msk [vmem:[%s4213_s11 + $0x20] sm:$0xff] %vm217_vm2, %v2688_v1 }
0x1a72   :  { %2438 = vrot.lane.b32.xlu1 %v4057_v56, %s3553_s27 }
0x1a76   :  { %2443 = vrot.lane.b32.xlu0 %v4097_v54, %s3553_s27 }
0x1aed   :  { %v2667_v3 = vpop.xlane.xlu0 %2666 }
0x1aee   :  { %3542 = vlog2.f32 %v2667_v3  ;;  %v2664_v4 = vpop.xlane.xlu1 %2663 }
0x1aef   :  { %3544 = vlog2.f32 %v2664_v4 }
0x1af1   :  { %v2444_v5 = vpop.permute.xlu0 %2443 }
0x1af2   :  { %2765 = vst.msk [vmem:[%s4214_s13 + $0x8] sm:$0xff] %vm217_vm2, %v2444_v5  ;;  %v2439_v6 = vpop.permute.xlu1 %2438 }
0x1af3   :  { %2441 = vst.msk [vmem:[%s4214_s13] sm:$0xff] %vm217_vm2, %v2439_v6 }
0x1af8   :  { %v3543_v7 = vpop.eup %3542 }
0x1af9   :  { %v3545_v56 = vpop.eup %3544  ;;  %v2683_v8 = vmul.f32 0.6931472, %v3543_v7 }
0x1afa   :  { %v2681_v54 = vmul.f32 0.6931472, %v3545_v56 }
0x1afb   :  { %v2691_v23 = vsub.f32 %v4143_v34, %v2683_v8 }
0x1afc   :  { %v2690_v25 = vsub.f32 %v4145_v36, %v2681_v54 }
0x1afd   :  { %2699 = vst.msk [vmem:[%s4213_s11 + $0x38] sm:$0xff] %vm217_vm2, %v2691_v23 }
0x1afe   :  { %2698 = vst.msk [vmem:[%s4213_s11 + $0x30] sm:$0xff] %vm217_vm2, %v2690_v25 }

</bundles_post_ra>
